<compile_context>
chip_gen: v5e
topology: v5e:2x2
jax: 0.10.0
libtpu: 0.0.40
codegen_flags: <defaults>
</compile_context>

<pallas_src>
import functools
import math
from typing import NamedTuple, Tuple

import jax
import jax.numpy as jnp
from jax.experimental import pallas as pl
from jax.experimental.pallas import tpu as pltpu

_LANE = 128  # MXU / lane granularity. tm multiples of 128 also satisfy the
             # sublane packing rule for f32 (8), bf16 (16) and int8/fp8 (32).


def _round_up(x: int, m: int) -> int:
    return ((x + m - 1) // m) * m


def _vmem_capacity_bytes() -> int:
    """Physical VMEM capacity of the local chip (conservative fallback)."""
    try:
        info = pltpu.get_tpu_info()
        cap = getattr(info, "vmem_capacity_bytes", None)
        if cap:
            return int(cap)
    except Exception:
        pass
    return 64 << 20  # assume v7x-sized VMEM if we cannot query


def _apply_activation(y, activation: str):
    """Activation applied in f32 (EUP-friendly on all generations)."""
    if activation == "relu":
        return jnp.maximum(y, 0.0)
    if activation == "sigmoid":
        return jax.nn.sigmoid(y)
    if activation == "tempsigmoid":
        temp = 12.0 / math.log(9.0)  # tempsigmoid(x) = sigmoid(x / (12/ln 9))
        return jax.nn.sigmoid(y * (1.0 / temp))
    if activation == "identity":
        return y
    raise ValueError(f"unknown activation: {activation}")


# ----------------------------------------------------------------------------
# Fused multi-layer kernel: one batch tile per grid step, all layers inside.
# Refs: (x_ref, w0, b0, w1, b1, ..., wL-1, bL-1, out_ref)
# ----------------------------------------------------------------------------
def _mlp_fused_kernel(x_ref, *refs, n_layers: int, activation: str, op_dtype):
    out_ref = refs[-1]
    wb_refs = refs[:-1]

    h = x_ref[...]
    if h.dtype != op_dtype:
        h = h.astype(op_dtype)  # e.g. f32 storage -> bf16 MXU operands

    for layer in range(n_layers):
        w = wb_refs[2 * layer][...]       # (p_in, p_out), op_dtype
        b = wb_refs[2 * layer + 1][...]   # (1, p_out)
        # MXU matmul with f32 accumulation; bias added once to the f32 acc.
        acc = jnp.dot(h, w, preferred_element_type=jnp.float32)
        acc = acc + b.astype(jnp.float32)
        # Activation in f32 (VPU/EUP), then back to operand dtype for next layer.
        h = _apply_activation(acc, activation)
        if layer + 1 < n_layers:
            h = h.astype(op_dtype)
        # TODO(synk): split this layer's output-feature dim with an inner
        # lax.fori_loop if tm x p_out f32 intermediates ever cause vreg spills.

    out_ref[...] = h.astype(out_ref.dtype)


# ----------------------------------------------------------------------------
# One-time parameter padding (cache the result across forward calls).
# ----------------------------------------------------------------------------
class PaddedMLPParams(NamedTuple):
    weights: Tuple[jax.Array, ...]  # each (p_in, p_out), zero-padded
    biases: Tuple[jax.Array, ...]   # each (1, p_out), zero-padded
    dims: Tuple[int, ...]           # true feature-dim chain (x_dim, ..., y_dim)
    pdims: Tuple[int, ...]          # lane-dense (128-multiple) padded chain


def prepare_mlp_params(params, *, compute_dtype=None) -> PaddedMLPParams:
    """Pad weights/biases to 128-multiples once.  `compute_dtype=jnp.bfloat16`
    enables the bf16-operand MXU fast path (f32 accumulation kept)."""
    dims = [params[0][0].shape[0]] + [w.shape[1] for (w, _) in params]
    pdims = [_round_up(d, _LANE) for d in dims]
    ws, bs = [], []
    for l, (w, b) in enumerate(params):
        d_in, d_out = w.shape
        p_in, p_out = pdims[l], pdims[l + 1]
        w_dtype = jnp.dtype(compute_dtype) if compute_dtype is not None else w.dtype
        # Invariant: padded weight ROWS are zero so padded activation columns
        # (which hold activation(0)) can never leak into real outputs.
        w_p = jnp.zeros((p_in, p_out), w_dtype).at[:d_in, :d_out].set(w.astype(w_dtype))
        b_p = jnp.zeros((1, p_out), b.dtype).at[:, :d_out].set(jnp.reshape(b, (1, d_out)))
        ws.append(w_p)
        bs.append(b_p)
    return PaddedMLPParams(tuple(ws), tuple(bs), tuple(dims), tuple(pdims))


# ----------------------------------------------------------------------------
# One fused pallas_call over a group of consecutive layers.
# ----------------------------------------------------------------------------
def _run_group(x_p, ws, bs, pdims, *, tm, activation, op_dtype, vmem_limit, out_dtype):
    b_pad, p_in = x_p.shape
    p_out = pdims[-1]
    n_layers = len(ws)
    grid = (b_pad // tm,)

    flops = 2 * b_pad * sum(pdims[l] * pdims[l + 1] for l in range(n_layers))
    trans = 0 if activation in ("relu", "identity") else b_pad * sum(pdims[1:])
    bytes_accessed = (
        x_p.size * x_p.dtype.itemsize
        + sum(w.size * w.dtype.itemsize for w in ws)
        + sum(b.size * b.dtype.itemsize for b in bs)
        + b_pad * p_out * jnp.dtype(out_dtype).itemsize
    )
    cost = pl.CostEstimate(flops=flops, transcendentals=trans, bytes_accessed=bytes_accessed)

    kernel = functools.partial(
        _mlp_fused_kernel, n_layers=n_layers, activation=activation, op_dtype=op_dtype
    )

    def launch(single_buffer_weights: bool):
        # Weights never change across grid steps: single-buffer them to halve
        # their VMEM footprint (biggest lever for fitting v7x's 64 MiB).
        wb_kw = {"pipeline_mode": pl.Buffered(1)} if single_buffer_weights else {}
        in_specs = [pl.BlockSpec((tm, p_in), lambda i: (i, 0))]
        wb_inputs = []
        for l in range(n_layers):
            pi, po = pdims[l], pdims[l + 1]
            in_specs.append(pl.BlockSpec((pi, po), lambda i: (0, 0), **wb_kw))
            in_specs.append(pl.BlockSpec((1, po), lambda i: (0, 0), **wb_kw))
            wb_inputs += [ws[l], bs[l]]
        out_spec = pl.BlockSpec((tm, p_out), lambda i: (i, 0))
        return pl.pallas_call(
            kernel,
            out_shape=jax.ShapeDtypeStruct((b_pad, p_out), out_dtype),
            grid=grid,
            in_specs=in_specs,
            out_specs=out_spec,
            compiler_params=pltpu.CompilerParams(
                dimension_semantics=("parallel",),
                vmem_limit_bytes=int(vmem_limit),
            ),
            cost_estimate=cost,
        )(x_p, *wb_inputs)

    try:
        return launch(True)
    except Exception:
        # Fallback: default double-buffered weight specs.
        return launch(False)


# ----------------------------------------------------------------------------
# Forward wrapper: VMEM-budget-driven tile / grid selection, optional layer
# grouping, padding strip.
# ----------------------------------------------------------------------------
def mlp_forward(x_set, params, *, activation: str = "relu", compute_dtype=None,
                max_batch_tile: int = 1024):
    if not isinstance(params, PaddedMLPParams):
        params = prepare_mlp_params(params, compute_dtype=compute_dtype)
    ws, bs, dims, pdims = params.weights, params.biases, params.dims, params.pdims
    n_layers = len(ws)

    batch, x_dim = x_set.shape
    assert x_dim == dims[0], (x_dim, dims[0])
    dtype = x_set.dtype
    elem = jnp.dtype(dtype).itemsize
    op_dtype = jnp.dtype(ws[0].dtype)

    # ---- VMEM budget from the real chip capacity -----------------------------
    cap = _vmem_capacity_bytes()                       # 128 MiB (v5e/v6e) / 64 MiB (v7x)
    budget = max(min(cap - (16 << 20), 100 << 20), 24 << 20)

    wbytes = [ws[l].size * ws[l].dtype.itemsize + bs[l].size * bs[l].dtype.itemsize
              for l in range(n_layers)]

    # Group consecutive layers so each group's resident (single-buffered)
    # weights stay under ~half the budget.  Common case: one group => whole MLP
    # fused in a single pallas_call; intermediates only hit HBM at group edges.
    weight_budget = budget // 2
    groups, cur, cur_b = [], [], 0
    for l in range(n_layers):
        if cur and cur_b + wbytes[l] > weight_budget:
            groups.append(cur)
            cur, cur_b = [], 0
        cur.append(l)
        cur_b += wbytes[l]
    groups.append(cur)
    # TODO(synk): tile the output-feature (N) dim when a single layer's padded
    # weights alone exceed the VMEM budget; such a layer currently becomes its
    # own group and relies on the vmem_limit headroom.

    max_group_wbytes = max(sum(wbytes[l] for l in g) for g in groups)
    pmax = max(pdims)

    # ---- batch tile: multiple of 128, sized from the VMEM budget -------------
    # per-row cost: double-buffered streamed x/out tiles + f32 intermediates.
    per_row = 2 * 2 * pmax * elem + 3 * pmax * 4
    avail = max(budget - max_group_wbytes, per_row * _LANE)
    tm_vmem = max(_LANE, (avail // per_row) // _LANE * _LANE)

    b128 = _round_up(max(batch, 1), _LANE)
    tm = min(max(_round_up(max_batch_tile, _LANE), _LANE), tm_vmem, b128)
    # Force >= 2 grid steps whenever the padded batch allows it so v7x's two
    # TensorCores both get work on the "parallel" axis (one extra ~0.35us step
    # on single-core chips).
    if b128 >= 2 * _LANE:
        tm = min(tm, _round_up(pl.cdiv(b128, 2), _LANE))
    tm = max(tm, _LANE)
    b_pad = _round_up(batch, tm)

    # ---- pad the input (batch rows + feature lanes); stripped at the end -----
    if (b_pad, pdims[0]) == (batch, x_dim):
        h = x_set
    else:
        h = jnp.zeros((b_pad, pdims[0]), dtype).at[:batch, :x_dim].set(x_set)

    # NOTE: x input keeps the default double buffer; on v7x a pl.Buffered(3)
    # here only helps if profiling shows exposed DMA (unlikely at 3.2 TB/s).
    for g in groups:
        g_ws = [ws[l] for l in g]
        g_bs = [bs[l] for l in g]
        g_pdims = [pdims[g[0]]] + [pdims[l + 1] for l in g]
        h = _run_group(h, g_ws, g_bs, g_pdims, tm=tm, activation=activation,
                       op_dtype=op_dtype, vmem_limit=budget, out_dtype=dtype)

    return h[:batch, :dims[-1]]


# ----------------------------------------------------------------------------
# Parameter init mirroring the PyTorch module (nn.Linear default uniform init).
# Weights stored (in_dim, out_dim) so the kernel computes x @ W + b, which
# equals PyTorch's x @ weight.T + bias.
# ----------------------------------------------------------------------------
def init_mlp_params(key, x_dim, hid_dim, y_dim, n_hidden_layers, dtype=jnp.float32):
    if n_hidden_layers == 0:
        shapes = [(x_dim, y_dim)]
    else:
        shapes = [(x_dim, hid_dim)]
        shapes += [(hid_dim, hid_dim)] * (n_hidden_layers - 1)
        shapes += [(hid_dim, y_dim)]

    params = []
    for (d_in, d_out) in shapes:
        key, kw, kb = jax.random.split(key, 3)
        bound = 1.0 / math.sqrt(d_in)
        w = jax.random.uniform(kw, (d_in, d_out), dtype, -bound, bound)
        b = jax.random.uniform(kb, (1, d_out), dtype, -bound, bound)
        params.append((w, b))
    return params


# ----------------------------------------------------------------------------
# Plain-JAX reference for correctness checks.
# ----------------------------------------------------------------------------
def mlp_forward_ref(x_set, params, *, activation="relu"):
    for (w, b) in params:
        x_set = _apply_activation(x_set @ w + b, activation)
    return x_set


if __name__ == "__main__":
    # Small shapes consistent with the module's forward (x_set: (batch, x_dim)).
    batch, x_dim, hid_dim, y_dim, n_hidden_layers = 8, 16, 32, 8, 2

    key = jax.random.PRNGKey(0)
    key, kx = jax.random.split(key)
    x_set = jax.random.normal(kx, (batch, x_dim), jnp.float32)
    params = init_mlp_params(key, x_dim, hid_dim, y_dim, n_hidden_layers)

    # Pad / pack the parameters once and reuse across forward calls.
    padded = prepare_mlp_params(params)

    # ReLU path (default activation choice for the module instantiation).
    out_relu = jax.block_until_ready(mlp_forward(x_set, padded, activation="relu"))
    ref_relu = mlp_forward_ref(x_set, params, activation="relu")
    assert out_relu.shape == (batch, y_dim), out_relu.shape
    assert jnp.allclose(out_relu, ref_relu, atol=1e-5, rtol=1e-5), "relu mismatch"

    # tempsigmoid path (the module's helper activation) -- exercises the EUP
    # branch and confirms zero-padded weight rows keep padded columns contained.
    out_ts = jax.block_until_ready(mlp_forward(x_set, padded, activation="tempsigmoid"))
    ref_ts = mlp_forward_ref(x_set, params, activation="tempsigmoid")
    assert jnp.allclose(out_ts, ref_ts, atol=1e-5, rtol=1e-5), "tempsigmoid mismatch"

    # Opt-in bf16 MXU fast path (f32 storage, bf16 operands, f32 accumulation).
    padded_bf16 = prepare_mlp_params(params, compute_dtype=jnp.bfloat16)
    out_bf16 = jax.block_until_ready(mlp_forward(x_set, padded_bf16, activation="relu"))
    assert out_bf16.shape == (batch, y_dim), out_bf16.shape
    assert bool(jnp.all(jnp.isfinite(out_bf16))), "bf16 path produced non-finite values"

    print("KERNEL_OK")
</pallas_src>

<mosaic_0001>
module attributes {stable_mosaic.version = 11 : i64} {
  func.func @_mlp_fused_kernel(%arg0: i32, %arg1: memref<128x128xf32, #tpu.memory_space<vmem>>, %arg2: memref<128x128xf32, #tpu.memory_space<vmem>>, %arg3: memref<1x128xf32, #tpu.memory_space<vmem>>, %arg4: memref<128x128xf32, #tpu.memory_space<vmem>>, %arg5: memref<1x128xf32, #tpu.memory_space<vmem>>, %arg6: memref<128x128xf32, #tpu.memory_space<vmem>>, %arg7: memref<1x128xf32, #tpu.memory_space<vmem>>, %arg8: memref<128x128xf32, #tpu.memory_space<vmem>>) attributes {dimension_semantics = [#tpu.dimension_semantics<parallel>], iteration_bounds = array<i64: 1>, scalar_prefetch = 0 : i64, scratch_operands = 0 : i64, tpu.core_type = #tpu.core_type<tc>, window_params = [{transform_indices = @transform_0, window_bounds = array<i64: 128, 128>}, {pipeline_mode = #tpu.pipeline_mode<synchronous>, transform_indices = @transform_1, window_bounds = array<i64: 128, 128>}, {pipeline_mode = #tpu.pipeline_mode<synchronous>, transform_indices = @transform_2, window_bounds = array<i64: 1, 128>}, {pipeline_mode = #tpu.pipeline_mode<synchronous>, transform_indices = @transform_3, window_bounds = array<i64: 128, 128>}, {pipeline_mode = #tpu.pipeline_mode<synchronous>, transform_indices = @transform_4, window_bounds = array<i64: 1, 128>}, {pipeline_mode = #tpu.pipeline_mode<synchronous>, transform_indices = @transform_5, window_bounds = array<i64: 128, 128>}, {pipeline_mode = #tpu.pipeline_mode<synchronous>, transform_indices = @transform_6, window_bounds = array<i64: 1, 128>}, {transform_indices = @transform_7, window_bounds = array<i64: 128, 128>}]} {
    %c0 = arith.constant 0 : index
    %c0_0 = arith.constant 0 : index
    %0 = vector.load %arg1[%c0, %c0_0] : memref<128x128xf32, #tpu.memory_space<vmem>>, vector<128x128xf32>
    %c0_1 = arith.constant 0 : index
    %c0_2 = arith.constant 0 : index
    %1 = vector.load %arg2[%c0_1, %c0_2] : memref<128x128xf32, #tpu.memory_space<vmem>>, vector<128x128xf32>
    %c0_3 = arith.constant 0 : index
    %c0_4 = arith.constant 0 : index
    %2 = vector.load %arg3[%c0_3, %c0_4] : memref<1x128xf32, #tpu.memory_space<vmem>>, vector<1x128xf32>
    %cst = arith.constant dense<0.000000e+00> : vector<128x128xf32>
    %3 = tpu.matmul %0, %1, %cst {dimension_numbers = #tpu.dot_dimension_numbers<[1], [0], [0], [1], [0, 0, 1, 1], [], []>} : vector<128x128xf32>, vector<128x128xf32>, vector<128x128xf32> -> vector<128x128xf32>
    %4 = vector.broadcast %2 : vector<1x128xf32> to vector<128x128xf32>
    %5 = arith.addf %3, %4 : vector<128x128xf32>
    %cst_5 = arith.constant 0.000000e+00 : f32
    %6 = vector.broadcast %cst_5 : f32 to vector<128x128xf32>
    %7 = arith.maximumf %5, %6 : vector<128x128xf32>
    %c0_6 = arith.constant 0 : index
    %c0_7 = arith.constant 0 : index
    %8 = vector.load %arg4[%c0_6, %c0_7] : memref<128x128xf32, #tpu.memory_space<vmem>>, vector<128x128xf32>
    %c0_8 = arith.constant 0 : index
    %c0_9 = arith.constant 0 : index
    %9 = vector.load %arg5[%c0_8, %c0_9] : memref<1x128xf32, #tpu.memory_space<vmem>>, vector<1x128xf32>
    %cst_10 = arith.constant dense<0.000000e+00> : vector<128x128xf32>
    %10 = tpu.matmul %7, %8, %cst_10 {dimension_numbers = #tpu.dot_dimension_numbers<[1], [0], [0], [1], [0, 0, 1, 1], [], []>} : vector<128x128xf32>, vector<128x128xf32>, vector<128x128xf32> -> vector<128x128xf32>
    %11 = vector.broadcast %9 : vector<1x128xf32> to vector<128x128xf32>
    %12 = arith.addf %10, %11 : vector<128x128xf32>
    %cst_11 = arith.constant 0.000000e+00 : f32
    %13 = vector.broadcast %cst_11 : f32 to vector<128x128xf32>
    %14 = arith.maximumf %12, %13 : vector<128x128xf32>
    %c0_12 = arith.constant 0 : index
    %c0_13 = arith.constant 0 : index
    %15 = vector.load %arg6[%c0_12, %c0_13] : memref<128x128xf32, #tpu.memory_space<vmem>>, vector<128x128xf32>
    %c0_14 = arith.constant 0 : index
    %c0_15 = arith.constant 0 : index
    %16 = vector.load %arg7[%c0_14, %c0_15] : memref<1x128xf32, #tpu.memory_space<vmem>>, vector<1x128xf32>
    %cst_16 = arith.constant dense<0.000000e+00> : vector<128x128xf32>
    %17 = tpu.matmul %14, %15, %cst_16 {dimension_numbers = #tpu.dot_dimension_numbers<[1], [0], [0], [1], [0, 0, 1, 1], [], []>} : vector<128x128xf32>, vector<128x128xf32>, vector<128x128xf32> -> vector<128x128xf32>
    %18 = vector.broadcast %16 : vector<1x128xf32> to vector<128x128xf32>
    %19 = arith.addf %17, %18 : vector<128x128xf32>
    %cst_17 = arith.constant 0.000000e+00 : f32
    %20 = vector.broadcast %cst_17 : f32 to vector<128x128xf32>
    %21 = arith.maximumf %19, %20 : vector<128x128xf32>
    %c0_18 = arith.constant 0 : index
    %c0_19 = arith.constant 0 : index
    %22 = vector.load %arg8[%c0_18, %c0_19] : memref<128x128xf32, #tpu.memory_space<vmem>>, vector<128x128xf32>
    tpu.vector_store %arg8[%c0_18, %c0_19], %21 {strides = array<i32>} : memref<128x128xf32, #tpu.memory_space<vmem>>, vector<128x128xf32>,
    return
  }
  func.func @transform_0(%arg0: i32) -> (i32, i32) {
    %c0_i32 = arith.constant 0 : i32
    %c0_i32_0 = arith.constant 0 : i32
    return %arg0, %c0_i32 : i32, i32
  }
  func.func @transform_1(%arg0: i32) -> (i32, i32) {
    %c0_i32 = arith.constant 0 : i32
    %c0_i32_0 = arith.constant 0 : i32
    %c0_i32_1 = arith.constant 0 : i32
    return %c0_i32, %c0_i32_0 : i32, i32
  }
  func.func @transform_2(%arg0: i32) -> (i32, i32) {
    %c0_i32 = arith.constant 0 : i32
    %c0_i32_0 = arith.constant 0 : i32
    %c0_i32_1 = arith.constant 0 : i32
    return %c0_i32, %c0_i32_0 : i32, i32
  }
  func.func @transform_3(%arg0: i32) -> (i32, i32) {
    %c0_i32 = arith.constant 0 : i32
    %c0_i32_0 = arith.constant 0 : i32
    %c0_i32_1 = arith.constant 0 : i32
    return %c0_i32, %c0_i32_0 : i32, i32
  }
  func.func @transform_4(%arg0: i32) -> (i32, i32) {
    %c0_i32 = arith.constant 0 : i32
    %c0_i32_0 = arith.constant 0 : i32
    %c0_i32_1 = arith.constant 0 : i32
    return %c0_i32, %c0_i32_0 : i32, i32
  }
  func.func @transform_5(%arg0: i32) -> (i32, i32) {
    %c0_i32 = arith.constant 0 : i32
    %c0_i32_0 = arith.constant 0 : i32
    %c0_i32_1 = arith.constant 0 : i32
    return %c0_i32, %c0_i32_0 : i32, i32
  }
  func.func @transform_6(%arg0: i32) -> (i32, i32) {
    %c0_i32 = arith.constant 0 : i32
    %c0_i32_0 = arith.constant 0 : i32
    %c0_i32_1 = arith.constant 0 : i32
    return %c0_i32, %c0_i32_0 : i32, i32
  }
  func.func @transform_7(%arg0: i32) -> (i32, i32) {
    %c0_i32 = arith.constant 0 : i32
    %c0_i32_0 = arith.constant 0 : i32
    return %arg0, %c0_i32 : i32, i32
  }
}

module attributes {stable_mosaic.version = 11 : i64} {
  func.func @_mlp_fused_kernel(%arg0: i32, %arg1: memref<128x128xf32, #tpu.memory_space<vmem>>, %arg2: memref<128x128xf32, #tpu.memory_space<vmem>>, %arg3: memref<1x128xf32, #tpu.memory_space<vmem>>, %arg4: memref<128x128xf32, #tpu.memory_space<vmem>>, %arg5: memref<1x128xf32, #tpu.memory_space<vmem>>, %arg6: memref<128x128xf32, #tpu.memory_space<vmem>>, %arg7: memref<1x128xf32, #tpu.memory_space<vmem>>, %arg8: memref<128x128xf32, #tpu.memory_space<vmem>>) attributes {dimension_semantics = [#tpu.dimension_semantics<parallel>], iteration_bounds = array<i64: 1>, scalar_prefetch = 0 : i64, scratch_operands = 0 : i64, tpu.core_type = #tpu.core_type<tc>, window_params = [{transform_indices = @transform_0, window_bounds = array<i64: 128, 128>}, {pipeline_mode = #tpu.pipeline_mode<synchronous>, transform_indices = @transform_1, window_bounds = array<i64: 128, 128>}, {pipeline_mode = #tpu.pipeline_mode<synchronous>, transform_indices = @transform_2, window_bounds = array<i64: 1, 128>}, {pipeline_mode = #tpu.pipeline_mode<synchronous>, transform_indices = @transform_3, window_bounds = array<i64: 128, 128>}, {pipeline_mode = #tpu.pipeline_mode<synchronous>, transform_indices = @transform_4, window_bounds = array<i64: 1, 128>}, {pipeline_mode = #tpu.pipeline_mode<synchronous>, transform_indices = @transform_5, window_bounds = array<i64: 128, 128>}, {pipeline_mode = #tpu.pipeline_mode<synchronous>, transform_indices = @transform_6, window_bounds = array<i64: 1, 128>}, {transform_indices = @transform_7, window_bounds = array<i64: 128, 128>}]} {
    %c0 = arith.constant 0 : index
    %c0_0 = arith.constant 0 : index
    %0 = vector.load %arg1[%c0, %c0_0] : memref<128x128xf32, #tpu.memory_space<vmem>>, vector<128x128xf32>
    %c0_1 = arith.constant 0 : index
    %c0_2 = arith.constant 0 : index
    %1 = vector.load %arg2[%c0_1, %c0_2] : memref<128x128xf32, #tpu.memory_space<vmem>>, vector<128x128xf32>
    %c0_3 = arith.constant 0 : index
    %c0_4 = arith.constant 0 : index
    %2 = vector.load %arg3[%c0_3, %c0_4] : memref<1x128xf32, #tpu.memory_space<vmem>>, vector<1x128xf32>
    %cst = arith.constant dense<0.000000e+00> : vector<128x128xf32>
    %3 = tpu.matmul %0, %1, %cst {dimension_numbers = #tpu.dot_dimension_numbers<[1], [0], [0], [1], [0, 0, 1, 1], [], []>} : vector<128x128xf32>, vector<128x128xf32>, vector<128x128xf32> -> vector<128x128xf32>
    %4 = vector.broadcast %2 : vector<1x128xf32> to vector<128x128xf32>
    %5 = arith.addf %3, %4 : vector<128x128xf32>
    %cst_5 = arith.constant 0.000000e+00 : f32
    %6 = vector.broadcast %cst_5 : f32 to vector<128x128xf32>
    %7 = arith.maximumf %5, %6 : vector<128x128xf32>
    %c0_6 = arith.constant 0 : index
    %c0_7 = arith.constant 0 : index
    %8 = vector.load %arg4[%c0_6, %c0_7] : memref<128x128xf32, #tpu.memory_space<vmem>>, vector<128x128xf32>
    %c0_8 = arith.constant 0 : index
    %c0_9 = arith.constant 0 : index
    %9 = vector.load %arg5[%c0_8, %c0_9] : memref<1x128xf32, #tpu.memory_space<vmem>>, vector<1x128xf32>
    %cst_10 = arith.constant dense<0.000000e+00> : vector<128x128xf32>
    %10 = tpu.matmul %7, %8, %cst_10 {dimension_numbers = #tpu.dot_dimension_numbers<[1], [0], [0], [1], [0, 0, 1, 1], [], []>} : vector<128x128xf32>, vector<128x128xf32>, vector<128x128xf32> -> vector<128x128xf32>
    %11 = vector.broadcast %9 : vector<1x128xf32> to vector<128x128xf32>
    %12 = arith.addf %10, %11 : vector<128x128xf32>
    %cst_11 = arith.constant 0.000000e+00 : f32
    %13 = vector.broadcast %cst_11 : f32 to vector<128x128xf32>
    %14 = arith.maximumf %12, %13 : vector<128x128xf32>
    %c0_12 = arith.constant 0 : index
    %c0_13 = arith.constant 0 : index
    %15 = vector.load %arg6[%c0_12, %c0_13] : memref<128x128xf32, #tpu.memory_space<vmem>>, vector<128x128xf32>
    %c0_14 = arith.constant 0 : index
    %c0_15 = arith.constant 0 : index
    %16 = vector.load %arg7[%c0_14, %c0_15] : memref<1x128xf32, #tpu.memory_space<vmem>>, vector<1x128xf32>
    %cst_16 = arith.constant dense<0.000000e+00> : vector<128x128xf32>
    %17 = tpu.matmul %14, %15, %cst_16 {dimension_numbers = #tpu.dot_dimension_numbers<[1], [0], [0], [1], [0, 0, 1, 1], [], []>} : vector<128x128xf32>, vector<128x128xf32>, vector<128x128xf32> -> vector<128x128xf32>
    %18 = vector.broadcast %16 : vector<1x128xf32> to vector<128x128xf32>
    %19 = arith.addf %17, %18 : vector<128x128xf32>
    %cst_17 = arith.constant 0.000000e+00 : f32
    %20 = vector.broadcast %cst_17 : f32 to vector<128x128xf32>
    %21 = arith.maximumf %19, %20 : vector<128x128xf32>
    %c0_18 = arith.constant 0 : index
    %c0_19 = arith.constant 0 : index
    %22 = vector.load %arg8[%c0_18, %c0_19] : memref<128x128xf32, #tpu.memory_space<vmem>>, vector<128x128xf32>
    tpu.vector_store %arg8[%c0_18, %c0_19], %21 {strides = array<i32>} : memref<128x128xf32, #tpu.memory_space<vmem>>, vector<128x128xf32>,
    return
  }
  func.func @transform_0(%arg0: i32) -> (i32, i32) {
    %c0_i32 = arith.constant 0 : i32
    %c0_i32_0 = arith.constant 0 : i32
    return %arg0, %c0_i32 : i32, i32
  }
  func.func @transform_1(%arg0: i32) -> (i32, i32) {
    %c0_i32 = arith.constant 0 : i32
    %c0_i32_0 = arith.constant 0 : i32
    %c0_i32_1 = arith.constant 0 : i32
    return %c0_i32, %c0_i32_0 : i32, i32
  }
  func.func @transform_2(%arg0: i32) -> (i32, i32) {
    %c0_i32 = arith.constant 0 : i32
    %c0_i32_0 = arith.constant 0 : i32
    %c0_i32_1 = arith.constant 0 : i32
    return %c0_i32, %c0_i32_0 : i32, i32
  }
  func.func @transform_3(%arg0: i32) -> (i32, i32) {
    %c0_i32 = arith.constant 0 : i32
    %c0_i32_0 = arith.constant 0 : i32
    %c0_i32_1 = arith.constant 0 : i32
    return %c0_i32, %c0_i32_0 : i32, i32
  }
  func.func @transform_4(%arg0: i32) -> (i32, i32) {
    %c0_i32 = arith.constant 0 : i32
    %c0_i32_0 = arith.constant 0 : i32
    %c0_i32_1 = arith.constant 0 : i32
    return %c0_i32, %c0_i32_0 : i32, i32
  }
  func.func @transform_5(%arg0: i32) -> (i32, i32) {
    %c0_i32 = arith.constant 0 : i32
    %c0_i32_0 = arith.constant 0 : i32
    %c0_i32_1 = arith.constant 0 : i32
    return %c0_i32, %c0_i32_0 : i32, i32
  }
  func.func @transform_6(%arg0: i32) -> (i32, i32) {
    %c0_i32 = arith.constant 0 : i32
    %c0_i32_0 = arith.constant 0 : i32
    %c0_i32_1 = arith.constant 0 : i32
    return %c0_i32, %c0_i32_0 : i32, i32
  }
  func.func @transform_7(%arg0: i32) -> (i32, i32) {
    %c0_i32 = arith.constant 0 : i32
    %c0_i32_0 = arith.constant 0 : i32
    return %arg0, %c0_i32 : i32, i32
  }
}

</mosaic_0001>

<bundles_post_ra>
// kernel: tpu_custom_call.1
= control target key start
LH: loop header
LB: loop body
LE: loop exit
PB: predicated region body
PF: predicated region fallthrough
CT: control target
= control target key end

     0   :  { %12 = vsyncpa [#allocation3], 0  ;;  %s754_s0 = inlined_call_operand.hbm [shape: f32[128,128], index: 0, kind: input, shape index: {}]   ;;  %s755_s1 = inlined_call_operand.hbm [shape: f32[128,128], index: 1, kind: input, shape index: {}]   ;;  %s756_s2 = inlined_call_operand.vmem [shape: f32[1,128], index: 2, kind: input, shape index: {}]   ;;  %s757_s3 = inlined_call_operand.hbm [shape: f32[128,128], index: 3, kind: input, shape index: {}]   ;;  %s758_s4 = inlined_call_operand.vmem [shape: f32[1,128], index: 4, kind: input, shape index: {}]   ;;  %s759_s5 = inlined_call_operand.hbm [shape: f32[128,128], index: 5, kind: input, shape index: {}]   ;;  %s760_s6 = inlined_call_operand.vmem [shape: f32[1,128], index: 6, kind: input, shape index: {}]   ;;  %s761_s7 = inlined_call_operand.hbm [shape: f32[128,128], index: 7, kind: output, shape index: {}]  }
   0x1   :  { %13 = vsyncpa [#allocation6], 0 }
   0x2   :  { %14 = vsyncpa [#allocation9], 0 }
   0x3   :  { %15 = vsyncpa [#allocation4], 0  ;;  %s33_s26 = sshll.u32 %s755_s1, 4  ;;  %s632_s27 = smov [#allocation5]   ;;  %s34_s26 = int_to_ptr.hbm [resolvable:$true] %s33_s26 }
   0x4   :  { %s35_s28 = sshll.u32 %s632_s27, 4  ;;  %s20_s8 = sshll.u32 %s754_s0, 4  ;;  %s36_s28 = int_to_ptr.vmem [resolvable:$true] %s35_s28  ;;  %s21_s8 = int_to_ptr.hbm [resolvable:$true] %s20_s8 }
   0x5   :  { %s633_s9 = smov 128   ;;  %s634_s10 = smov 8  }
   0x6   :  { %41 = dma.hbm_to_vmem [thread:$0]  %s34_s26, 2048, %s36_s28, [#allocation6], %s633_s9, %s633_s9, %s634_s10  }
   0x7   :  { %s635_s11 = smov [#allocation2]   ;;  %s48_s1 = sshll.u32 %s757_s3, 4  ;;  %s49_s1 = int_to_ptr.hbm [resolvable:$true] %s48_s1 }
   0x8   :  { %s22_s12 = sshll.u32 %s635_s11, 4  ;;  %s63_s16 = sshll.u32 %s759_s5, 4  ;;  %s23_s12 = int_to_ptr.vmem [resolvable:$true] %s22_s12  ;;  %s64_s16 = int_to_ptr.hbm [resolvable:$true] %s63_s16 }
   0x9   :  { %28 = dma.hbm_to_vmem [thread:$0]  %s21_s8, 2048, %s23_s12, [#allocation3], %s633_s9, %s633_s9, %s634_s10  }
   0xa   :  { %s636_s17 = smov [#allocation7]   ;;  %s637_s19 = smov [#allocation8]  }
   0xb   :  { %s50_s18 = sshll.u32 %s636_s17, 4  ;;  %s65_s3 = sshll.u32 %s637_s19, 4  ;;  %s51_s18 = int_to_ptr.vmem [resolvable:$true] %s50_s18  ;;  %s66_s3 = int_to_ptr.vmem [resolvable:$true] %s65_s3 }
   0xc   :  { %56 = dma.hbm_to_vmem [thread:$0]  %s49_s1, 2048, %s51_s18, [#allocation6], %s633_s9, %s633_s9, %s634_s10  }
   0xd   :  { %71 = dma.hbm_to_vmem [thread:$0]  %s64_s16, 2048, %s66_s3, [#allocation9], %s633_s9, %s633_s9, %s634_s10  }
   0xe   :  { %624 = dma.done.wait [#allocation3], 2048  }
   0xf   :  { %625 = vsyncadd [#allocation3], 4294965248 }
  0x10   :  { %626 = dma.done.wait [#allocation6], 4096  }
  0x11   :  { %627 = vsyncadd [#allocation6], 4294963200 }
  0x12   :  { %628 = dma.done.wait [#allocation9], 2048  }
  0x13   :  { %629 = vsyncadd [#allocation9], 4294965248  ;;  %v121_v0 = vld [vmem:[#allocation5 + $0x78] sm:$0xff]  ;;  %v120_v1 = vld [vmem:[#allocation5 + $0x70] sm:$0xff]  ;;  %s431_s26 = sshll.u32 %s761_s7, 4  ;;  %s432_s26 = int_to_ptr.hbm [resolvable:$true] %s431_s26 }
  0x14   :  { %126 = vmatpush.msra.mxu0 %v121_v0  ;;  %446 = vmatpush.msra.mxu3 %v121_v0  ;;  %v119_v2 = vld [vmem:[#allocation5 + $0x68] sm:$0xff]  ;;  %v118_v3 = vld [vmem:[#allocation5 + $0x60] sm:$0xff]  ;;  %v117_v4 = vld [vmem:[#allocation5 + $0x58] sm:$0xff] }
  0x15   :  { %v116_v5 = vld [vmem:[#allocation5 + $0x50] sm:$0xff]  ;;  %v115_v6 = vld [vmem:[#allocation5 + $0x48] sm:$0xff]  ;;  %v114_v7 = vld [vmem:[#allocation5 + $0x40] sm:$0xff] }
  0x16   :  { %127 = vmatpush.msra.mxu0 %v120_v1  ;;  %447 = vmatpush.msra.mxu3 %v120_v1  ;;  %v113_v8 = vld [vmem:[#allocation5 + $0x38] sm:$0xff]  ;;  %v112_v9 = vld [vmem:[#allocation5 + $0x30] sm:$0xff]  ;;  %v111_v10 = vld [vmem:[#allocation5 + $0x28] sm:$0xff] }
  0x17   :  { %v110_v11 = vld [vmem:[#allocation5 + $0x20] sm:$0xff]  ;;  %v109_v12 = vld [vmem:[#allocation5 + $0x18] sm:$0xff]  ;;  %v108_v13 = vld [vmem:[#allocation5 + $0x10] sm:$0xff] }
  0x18   :  { %128 = vmatpush.msra.mxu0 %v119_v2  ;;  %448 = vmatpush.msra.mxu3 %v119_v2  ;;  %v107_v14 = vld [vmem:[#allocation5 + $0x8] sm:$0xff]  ;;  %v106_v15 = vld [vmem:[#allocation5] sm:$0xff]  ;;  %v92_v18 = vld [vmem:[#allocation2 + $0x10] sm:$0xff] }
  0x19   :  { %v90_v16 = vld [vmem:[#allocation2] sm:$0xff]  ;;  %v91_v17 = vld [vmem:[#allocation2 + $0x8] sm:$0xff]  ;;  %v93_v20 = vld [vmem:[#allocation2 + $0x18] sm:$0xff] }
  0x1a   :  { %129 = vmatpush.msra.mxu0 %v118_v3  ;;  %449 = vmatpush.msra.mxu3 %v118_v3  ;;  %v102_v19 = vld [vmem:[#allocation2 + $0x60] sm:$0xff]  ;;  %v103_v21 = vld [vmem:[#allocation2 + $0x68] sm:$0xff]  ;;  %v104_v23 = vld [vmem:[#allocation2 + $0x70] sm:$0xff] }
  0x1b   :  { %v94_v22 = vld [vmem:[#allocation2 + $0x20] sm:$0xff]  ;;  %v95_v24 = vld [vmem:[#allocation2 + $0x28] sm:$0xff]  ;;  %v105_v25 = vld [vmem:[#allocation2 + $0x78] sm:$0xff] }
  0x1c   :  { %130 = vmatpush.msra.mxu0 %v117_v4  ;;  %450 = vmatpush.msra.mxu3 %v117_v4  ;;  %v96_v26 = vld [vmem:[#allocation2 + $0x30] sm:$0xff]  ;;  %v97_v27 = vld [vmem:[#allocation2 + $0x38] sm:$0xff]  ;;  %v220_v30 = vld [vmem:[#allocation7 + $0x68] sm:$0xff] }
  0x1d   :  { %v222_v28 = vld [vmem:[#allocation7 + $0x78] sm:$0xff]  ;;  %v221_v29 = vld [vmem:[#allocation7 + $0x70] sm:$0xff]  ;;  %v219_v31 = vld [vmem:[#allocation7 + $0x60] sm:$0xff] }
  0x1e   :  { %131 = vmatpush.msra.mxu0 %v116_v5  ;;  %451 = vmatpush.msra.mxu3 %v116_v5  ;;  %v98_v32 = vld [vmem:[#allocation2 + $0x40] sm:$0xff]  ;;  %v218_v33 = vld [vmem:[#allocation7 + $0x58] sm:$0xff]  ;;  %v217_v34 = vld [vmem:[#allocation7 + $0x50] sm:$0xff] }
  0x1f   :  { %227 = vmatpush.msra.mxu1 %v222_v28  ;;  %v216_v35 = vld [vmem:[#allocation7 + $0x48] sm:$0xff]  ;;  %v215_v36 = vld [vmem:[#allocation7 + $0x40] sm:$0xff]  ;;  %v214_v38 = vld [vmem:[#allocation7 + $0x38] sm:$0xff] }
  0x20   :  { %132 = vmatpush.msra.mxu0 %v115_v6  ;;  %452 = vmatpush.msra.mxu3 %v115_v6  ;;  %v99_v37 = vld [vmem:[#allocation2 + $0x48] sm:$0xff]  ;;  %v213_v39 = vld [vmem:[#allocation7 + $0x30] sm:$0xff]  ;;  %v211_v41 = vld [vmem:[#allocation7 + $0x20] sm:$0xff] }
  0x21   :  { %228 = vmatpush.msra.mxu1 %v221_v29  ;;  %v212_v40 = vld [vmem:[#allocation7 + $0x28] sm:$0xff]  ;;  %v100_v42 = vld [vmem:[#allocation2 + $0x50] sm:$0xff]  ;;  %v210_v43 = vld [vmem:[#allocation7 + $0x18] sm:$0xff] }
  0x22   :  { %133 = vmatpush.msra.mxu0 %v114_v7  ;;  %453 = vmatpush.msra.mxu3 %v114_v7  ;;  %v101_v44 = vld [vmem:[#allocation2 + $0x58] sm:$0xff]  ;;  %v209_v45 = vld [vmem:[#allocation7 + $0x10] sm:$0xff]  ;;  %v208_v46 = vld [vmem:[#allocation7 + $0x8] sm:$0xff] }
  0x23   :  { %229 = vmatpush.msra.mxu1 %v220_v30  ;;  %v207_v47 = vld [vmem:[#allocation7] sm:$0xff] }
  0x24   :  { %134 = vmatpush.msra.mxu0 %v113_v8  ;;  %454 = vmatpush.msra.mxu3 %v113_v8  ;;  %v706_v48 = vld [vmem:[%s756_s2] ss:$0 sm:$0xff] }
  0x25   :  { %230 = vmatpush.msra.mxu1 %v219_v31 }
  0x26   :  { %135 = vmatpush.msra.mxu0 %v112_v9  ;;  %455 = vmatpush.msra.mxu3 %v112_v9 }
  0x27   :  { %231 = vmatpush.msra.mxu1 %v218_v33 }
  0x28   :  { %136 = vmatpush.msra.mxu0 %v111_v10  ;;  %456 = vmatpush.msra.mxu3 %v111_v10 }
  0x29   :  { %232 = vmatpush.msra.mxu1 %v217_v34 }
  0x2a   :  { %137 = vmatpush.msra.mxu0 %v110_v11  ;;  %457 = vmatpush.msra.mxu3 %v110_v11 }
  0x2b   :  { %233 = vmatpush.msra.mxu1 %v216_v35 }
  0x2c   :  { %138 = vmatpush.msra.mxu0 %v109_v12  ;;  %458 = vmatpush.msra.mxu3 %v109_v12 }
  0x2d   :  { %234 = vmatpush.msra.mxu1 %v215_v36 }
  0x2e   :  { %139 = vmatpush.msra.mxu0 %v108_v13  ;;  %459 = vmatpush.msra.mxu3 %v108_v13 }
  0x2f   :  { %235 = vmatpush.msra.mxu1 %v214_v38 }
  0x30   :  { %140 = vmatpush.msra.mxu0 %v107_v14  ;;  %460 = vmatpush.msra.mxu3 %v107_v14 }
  0x31   :  { %236 = vmatpush.msra.mxu1 %v213_v39 }
  0x32   :  { %141 = vmatpush.msra.mxu0 %v106_v15  ;;  %461 = vmatpush.msra.mxu3 %v106_v15 }
  0x33   :  { %142 = vmatmul.f32.vlgmr.msra.gmra.mxu0 %v90_v16  ;;  %178 = vmatmul.f32.vlgmr.msra.gmra.mxu3 %v102_v19 }
  0x34   :  { %462 = vmatpush.msrb.mxu3 %v222_v28  ;;  %237 = vmatpush.msra.mxu1 %v212_v40  ;;  %v319_v28 = vld [vmem:[#allocation8 + $0x58] sm:$0xff] }
  0x36   :  { %463 = vmatpush.msrb.mxu3 %v221_v29  ;;  %238 = vmatpush.msra.mxu1 %v211_v41  ;;  %v318_v29 = vld [vmem:[#allocation8 + $0x50] sm:$0xff] }
  0x38   :  { %464 = vmatpush.msrb.mxu3 %v220_v30  ;;  %239 = vmatpush.msra.mxu1 %v210_v43  ;;  %v317_v30 = vld [vmem:[#allocation8 + $0x48] sm:$0xff] }
  0x3a   :  { %465 = vmatpush.msrb.mxu3 %v219_v31  ;;  %240 = vmatpush.msra.mxu1 %v209_v45 }
  0x3b   :  { %145 = vmatmul.f32.gmra.mxu0 %v91_v17  ;;  %181 = vmatmul.f32.gmra.mxu3 %v103_v21  ;;  %v323_v21 = vld [vmem:[#allocation8 + $0x78] sm:$0xff] }
  0x3c   :  { %466 = vmatpush.msrb.mxu3 %v218_v33  ;;  %241 = vmatpush.msra.mxu1 %v208_v46  ;;  %v316_v33 = vld [vmem:[#allocation8 + $0x40] sm:$0xff] }
  0x3d   :  { %328 = vmatpush.msra.mxu2 %v323_v21 }
  0x3e   :  { %467 = vmatpush.msrb.mxu3 %v217_v34  ;;  %242 = vmatpush.msra.mxu1 %v207_v47 }
  0x40   :  { %468 = vmatpush.msrb.mxu3 %v216_v35  ;;  %v315_v35 = vld [vmem:[#allocation8 + $0x38] sm:$0xff] }
  0x42   :  { %469 = vmatpush.msrb.mxu3 %v215_v36  ;;  %v314_v36 = vld [vmem:[#allocation8 + $0x30] sm:$0xff] }
  0x43   :  { %148 = vmatmul.f32.gmra.mxu0 %v92_v18  ;;  %184 = vmatmul.f32.gmra.mxu3 %v104_v23  ;;  %v321_v23 = vld [vmem:[#allocation8 + $0x68] sm:$0xff] }
  0x44   :  { %470 = vmatpush.msrb.mxu3 %v214_v38 }
  0x46   :  { %471 = vmatpush.msrb.mxu3 %v213_v39 }
  0x48   :  { %472 = vmatpush.msrb.mxu3 %v212_v40  ;;  %v312_v40 = vld [vmem:[#allocation8 + $0x20] sm:$0xff] }
  0x4a   :  { %473 = vmatpush.msrb.mxu3 %v211_v41 }
  0x4b   :  { %151 = vmatmul.f32.gmra.mxu0 %v93_v20  ;;  %187 = vmatmul.f32.gmra.mxu3 %v105_v25 }
  0x4c   :  { %474 = vmatpush.msrb.mxu3 %v210_v43 }
  0x4e   :  { %475 = vmatpush.msrb.mxu3 %v209_v45 }
  0x50   :  { %476 = vmatpush.msrb.mxu3 %v208_v46  ;;  %v310_v46 = vld [vmem:[#allocation8 + $0x10] sm:$0xff] }
  0x52   :  { %477 = vmatpush.msrb.mxu3 %v207_v47  ;;  %v309_v47 = vld [vmem:[#allocation8 + $0x8] sm:$0xff] }
  0x53   :  { %154 = vmatmul.f32.gmra.mxu0 %v94_v22  ;;  %v322_v22 = vld [vmem:[#allocation8 + $0x70] sm:$0xff] }
  0x54   :  { %478 = vmatpush.msra.mxu3 %v323_v21  ;;  %329 = vmatpush.msra.mxu2 %v322_v22 }
  0x56   :  { %479 = vmatpush.msra.mxu3 %v322_v22  ;;  %330 = vmatpush.msra.mxu2 %v321_v23 }
  0x58   :  { %480 = vmatpush.msra.mxu3 %v321_v23 }
  0x5b   :  { %157 = vmatmul.f32.gmra.mxu0 %v95_v24 }
  0x63   :  { %160 = vmatmul.f32.gmra.mxu0 %v96_v26  ;;  %v320_v26 = vld [vmem:[#allocation8 + $0x60] sm:$0xff] }
  0x64   :  { %331 = vmatpush.msra.mxu2 %v320_v26  ;;  %481 = vmatpush.msra.mxu3 %v320_v26 }
  0x66   :  { %332 = vmatpush.msra.mxu2 %v319_v28  ;;  %482 = vmatpush.msra.mxu3 %v319_v28 }
  0x68   :  { %333 = vmatpush.msra.mxu2 %v318_v29  ;;  %483 = vmatpush.msra.mxu3 %v318_v29 }
  0x6a   :  { %334 = vmatpush.msra.mxu2 %v317_v30  ;;  %484 = vmatpush.msra.mxu3 %v317_v30 }
  0x6b   :  { %163 = vmatmul.f32.gmra.mxu0 %v97_v27 }
  0x6c   :  { %335 = vmatpush.msra.mxu2 %v316_v33  ;;  %485 = vmatpush.msra.mxu3 %v316_v33 }
  0x6e   :  { %336 = vmatpush.msra.mxu2 %v315_v35  ;;  %486 = vmatpush.msra.mxu3 %v315_v35 }
  0x70   :  { %337 = vmatpush.msra.mxu2 %v314_v36  ;;  %487 = vmatpush.msra.mxu3 %v314_v36 }
  0x73   :  { %166 = vmatmul.f32.gmra.mxu0 %v98_v32 }
  0x7b   :  { %169 = vmatmul.f32.gmra.mxu0 %v99_v37  ;;  %v313_v37 = vld [vmem:[#allocation8 + $0x28] sm:$0xff] }
  0x7c   :  { %338 = vmatpush.msra.mxu2 %v313_v37  ;;  %488 = vmatpush.msra.mxu3 %v313_v37 }
  0x7e   :  { %339 = vmatpush.msra.mxu2 %v312_v40  ;;  %489 = vmatpush.msra.mxu3 %v312_v40 }
  0x83   :  { %172 = vmatmul.f32.gmra.mxu0 %v100_v42  ;;  %v311_v42 = vld [vmem:[#allocation8 + $0x18] sm:$0xff] }
  0x84   :  { %340 = vmatpush.msra.mxu2 %v311_v42  ;;  %490 = vmatpush.msra.mxu3 %v311_v42 }
  0x86   :  { %341 = vmatpush.msra.mxu2 %v310_v46  ;;  %491 = vmatpush.msra.mxu3 %v310_v46 }
  0x88   :  { %342 = vmatpush.msra.mxu2 %v309_v47  ;;  %492 = vmatpush.msra.mxu3 %v309_v47 }
  0x8b   :  { %175 = vmatmul.f32.gmra.mxu0 %v101_v44 }
  0xb0   :  { %v143_v49 = vpop.f32.mrf.mxu0 }
  0xb1   :  { %v144_v50 = vadd.f32 %v706_v48, %v143_v49  ;;  %v308_v49 = vld [vmem:[#allocation8] sm:$0xff] }
  0xb2   :  { %343 = vmatpush.msra.mxu2 %v308_v49  ;;  %493 = vmatpush.msra.mxu3 %v308_v49 }
  0xb3   :  { %v191_v51 = vmax.f32 %v144_v50, 0.0  ;;  %v502_v50 = vld [vmem:[%s758_s4] ss:$0 sm:$0xff] }
  0xb5   :  { %243 = vmatmul.f32.vlgmr.msra.gmra.mxu1 %v191_v51 }
  0xb6   :  { %v179_v60 = vpop.f32.mrf.mxu3 }
  0xb7   :  { %v180_v62 = vadd.f32 %v706_v48, %v179_v60 }
  0xb8   :  { %v146_v52 = vpop.f32.mrf.mxu0 }
  0xb9   :  { %v147_v53 = vadd.f32 %v706_v48, %v146_v52  ;;  %v203_v63 = vmax.f32 %v180_v62, 0.0 }
  0xbb   :  { %v192_v54 = vmax.f32 %v147_v53, 0.0  ;;  %279 = vmatmul.f32.vlgmr.msrb.gmra.mxu3 %v203_v63 }
  0xbd   :  { %246 = vmatmul.f32.gmra.mxu1 %v192_v54 }
  0xbe   :  { %v182_v2 = vpop.f32.mrf.mxu3 }
  0xbf   :  { %v183_v4 = vadd.f32 %v706_v48, %v182_v2 }
  0xc0   :  { %v149_v55 = vpop.f32.mrf.mxu0 }
  0xc1   :  { %v150_v56 = vadd.f32 %v706_v48, %v149_v55  ;;  %v204_v5 = vmax.f32 %v183_v4, 0.0 }
  0xc3   :  { %v193_v57 = vmax.f32 %v150_v56, 0.0  ;;  %282 = vmatmul.f32.gmra.mxu3 %v204_v5 }
  0xc5   :  { %249 = vmatmul.f32.gmra.mxu1 %v193_v57 }
  0xc6   :  { %v185_v8 = vpop.f32.mrf.mxu3 }
  0xc7   :  { %v186_v10 = vadd.f32 %v706_v48, %v185_v8 }
  0xc8   :  { %v152_v58 = vpop.f32.mrf.mxu0 }
  0xc9   :  { %v153_v59 = vadd.f32 %v706_v48, %v152_v58  ;;  %v205_v11 = vmax.f32 %v186_v10, 0.0 }
  0xcb   :  { %v194_v61 = vmax.f32 %v153_v59, 0.0  ;;  %285 = vmatmul.f32.gmra.mxu3 %v205_v11 }
  0xcd   :  { %252 = vmatmul.f32.gmra.mxu1 %v194_v61 }
  0xce   :  { %v188_v14 = vpop.f32.mrf.mxu3 }
  0xcf   :  { %v189_v16 = vadd.f32 %v706_v48, %v188_v14 }
  0xd0   :  { %v155_v0 = vpop.f32.mrf.mxu0 }
  0xd1   :  { %v156_v1 = vadd.f32 %v706_v48, %v155_v0  ;;  %v206_v17 = vmax.f32 %v189_v16, 0.0 }
  0xd3   :  { %v195_v3 = vmax.f32 %v156_v1, 0.0  ;;  %288 = vmatmul.f32.gmra.mxu3 %v206_v17 }
  0xd5   :  { %255 = vmatmul.f32.gmra.mxu1 %v195_v3 }
  0xd8   :  { %v158_v6 = vpop.f32.mrf.mxu0 }
  0xd9   :  { %v159_v7 = vadd.f32 %v706_v48, %v158_v6 }
  0xdb   :  { %v196_v9 = vmax.f32 %v159_v7, 0.0 }
  0xdd   :  { %258 = vmatmul.f32.gmra.mxu1 %v196_v9 }
  0xe0   :  { %v161_v12 = vpop.f32.mrf.mxu0 }
  0xe1   :  { %v162_v13 = vadd.f32 %v706_v48, %v161_v12 }
  0xe3   :  { %v197_v15 = vmax.f32 %v162_v13, 0.0 }
  0xe5   :  { %261 = vmatmul.f32.gmra.mxu1 %v197_v15 }
  0xe8   :  { %v164_v18 = vpop.f32.mrf.mxu0 }
  0xe9   :  { %v165_v19 = vadd.f32 %v706_v48, %v164_v18 }
  0xeb   :  { %v198_v20 = vmax.f32 %v165_v19, 0.0 }
  0xed   :  { %264 = vmatmul.f32.gmra.mxu1 %v198_v20 }
  0xf0   :  { %v167_v24 = vpop.f32.mrf.mxu0 }
  0xf1   :  { %v168_v25 = vadd.f32 %v706_v48, %v167_v24 }
  0xf3   :  { %v199_v27 = vmax.f32 %v168_v25, 0.0 }
  0xf5   :  { %267 = vmatmul.f32.gmra.mxu1 %v199_v27 }
  0xf8   :  { %v170_v31 = vpop.f32.mrf.mxu0 }
  0xf9   :  { %v171_v32 = vadd.f32 %v706_v48, %v170_v31 }
  0xfb   :  { %v200_v34 = vmax.f32 %v171_v32, 0.0 }
  0xfd   :  { %270 = vmatmul.f32.gmra.mxu1 %v200_v34  ;;  %v730_v34 = vld [vmem:[%s760_s6] ss:$0 sm:$0xff]  ;;  %s638_s6 = smov [#allocation10]  }
  0xfe   :  { %s429_s23 = sshll.u32 %s638_s6, 4  ;;  %s430_s23 = int_to_ptr.vmem [resolvable:$true] %s429_s23 }
 0x100   :  { %v173_v38 = vpop.f32.mrf.mxu0 }
 0x101   :  { %v174_v39 = vadd.f32 %v706_v48, %v173_v38 }
 0x103   :  { %v201_v41 = vmax.f32 %v174_v39, 0.0 }
 0x105   :  { %273 = vmatmul.f32.gmra.mxu1 %v201_v41 }
 0x108   :  { %v176_v43 = vpop.f32.mrf.mxu0 }
 0x109   :  { %v177_v44 = vadd.f32 %v706_v48, %v176_v43 }
 0x10b   :  { %v202_v45 = vmax.f32 %v177_v44, 0.0 }
 0x10d   :  { %276 = vmatmul.f32.gmra.mxu1 %v202_v45 }
 0x132   :  { %v244_v51 = vpop.f32.mrf.mxu1 }
 0x133   :  { %v245_v52 = vadd.f32 %v502_v50, %v244_v51 }
 0x135   :  { %v292_v53 = vmax.f32 %v245_v52, 0.0 }
 0x137   :  { %344 = vmatmul.f32.vlgmr.msra.gmra.mxu2 %v292_v53 }
 0x13a   :  { %v247_v48 = vpop.f32.mrf.mxu1 }
 0x13b   :  { %v248_v54 = vadd.f32 %v502_v50, %v247_v48 }
 0x13d   :  { %v293_v55 = vmax.f32 %v248_v54, 0.0 }
 0x13e   :  { %v280_v63 = vpop.f32.mrf.mxu3 }
 0x13f   :  { %347 = vmatmul.f32.gmra.mxu2 %v293_v55  ;;  %v281_v1 = vadd.f32 %v502_v50, %v280_v63 }
 0x141   :  { %v304_v3 = vmax.f32 %v281_v1, 0.0 }
 0x142   :  { %v250_v56 = vpop.f32.mrf.mxu1 }
 0x143   :  { %v251_v57 = vadd.f32 %v502_v50, %v250_v56  ;;  %380 = vmatmul.f32.vlgmr.msra.gmra.mxu3 %v304_v3 }
 0x145   :  { %v294_v58 = vmax.f32 %v251_v57, 0.0 }
 0x146   :  { %v283_v5 = vpop.f32.mrf.mxu3 }
 0x147   :  { %350 = vmatmul.f32.gmra.mxu2 %v294_v58  ;;  %v284_v7 = vadd.f32 %v502_v50, %v283_v5 }
 0x149   :  { %v305_v9 = vmax.f32 %v284_v7, 0.0 }
 0x14a   :  { %v253_v59 = vpop.f32.mrf.mxu1 }
 0x14b   :  { %v254_v60 = vadd.f32 %v502_v50, %v253_v59  ;;  %383 = vmatmul.f32.gmra.mxu3 %v305_v9 }
 0x14d   :  { %v295_v61 = vmax.f32 %v254_v60, 0.0 }
 0x14e   :  { %v286_v11 = vpop.f32.mrf.mxu3 }
 0x14f   :  { %353 = vmatmul.f32.gmra.mxu2 %v295_v61  ;;  %v287_v13 = vadd.f32 %v502_v50, %v286_v11 }
 0x151   :  { %v306_v15 = vmax.f32 %v287_v13, 0.0 }
 0x152   :  { %v256_v62 = vpop.f32.mrf.mxu1 }
 0x153   :  { %v257_v0 = vadd.f32 %v502_v50, %v256_v62  ;;  %386 = vmatmul.f32.gmra.mxu3 %v306_v15 }
 0x155   :  { %v296_v2 = vmax.f32 %v257_v0, 0.0 }
 0x156   :  { %v289_v17 = vpop.f32.mrf.mxu3 }
 0x157   :  { %356 = vmatmul.f32.gmra.mxu2 %v296_v2  ;;  %v290_v19 = vadd.f32 %v502_v50, %v289_v17 }
 0x159   :  { %v307_v21 = vmax.f32 %v290_v19, 0.0 }
 0x15a   :  { %v259_v4 = vpop.f32.mrf.mxu1 }
 0x15b   :  { %v260_v6 = vadd.f32 %v502_v50, %v259_v4  ;;  %389 = vmatmul.f32.gmra.mxu3 %v307_v21 }
 0x15d   :  { %v297_v8 = vmax.f32 %v260_v6, 0.0 }
 0x15f   :  { %359 = vmatmul.f32.gmra.mxu2 %v297_v8 }
 0x162   :  { %v262_v10 = vpop.f32.mrf.mxu1 }
 0x163   :  { %v263_v12 = vadd.f32 %v502_v50, %v262_v10 }
 0x165   :  { %v298_v14 = vmax.f32 %v263_v12, 0.0 }
 0x167   :  { %362 = vmatmul.f32.gmra.mxu2 %v298_v14 }
 0x16a   :  { %v265_v16 = vpop.f32.mrf.mxu1 }
 0x16b   :  { %v266_v18 = vadd.f32 %v502_v50, %v265_v16 }
 0x16d   :  { %v299_v20 = vmax.f32 %v266_v18, 0.0 }
 0x16f   :  { %365 = vmatmul.f32.gmra.mxu2 %v299_v20 }
 0x172   :  { %v268_v22 = vpop.f32.mrf.mxu1 }
 0x173   :  { %v269_v23 = vadd.f32 %v502_v50, %v268_v22 }
 0x175   :  { %v300_v24 = vmax.f32 %v269_v23, 0.0 }
 0x177   :  { %368 = vmatmul.f32.gmra.mxu2 %v300_v24 }
 0x17a   :  { %v271_v25 = vpop.f32.mrf.mxu1 }
 0x17b   :  { %v272_v26 = vadd.f32 %v502_v50, %v271_v25 }
 0x17d   :  { %v301_v27 = vmax.f32 %v272_v26, 0.0 }
 0x17f   :  { %371 = vmatmul.f32.gmra.mxu2 %v301_v27 }
 0x182   :  { %v274_v28 = vpop.f32.mrf.mxu1 }
 0x183   :  { %v275_v29 = vadd.f32 %v502_v50, %v274_v28 }
 0x185   :  { %v302_v30 = vmax.f32 %v275_v29, 0.0 }
 0x187   :  { %374 = vmatmul.f32.gmra.mxu2 %v302_v30 }
 0x18a   :  { %v277_v31 = vpop.f32.mrf.mxu1 }
 0x18b   :  { %v278_v32 = vadd.f32 %v502_v50, %v277_v31 }
 0x18d   :  { %v303_v33 = vmax.f32 %v278_v32, 0.0 }
 0x18f   :  { %377 = vmatmul.f32.gmra.mxu2 %v303_v33 }
 0x1ba   :  { %v345_v35 = vpop.f32.mrf.mxu2 }
 0x1bb   :  { %v346_v36 = vadd.f32 %v730_v34, %v345_v35 }
 0x1bd   :  { %v393_v37 = vmax.f32 %v346_v36, 0.0 }
 0x1bf   :  { %409 = vst [vmem:[#allocation10] sm:$0xff] %v393_v37 }
 0x1c2   :  { %v348_v38 = vpop.f32.mrf.mxu2 }
 0x1c3   :  { %v349_v39 = vadd.f32 %v730_v34, %v348_v38 }
 0x1c5   :  { %v394_v40 = vmax.f32 %v349_v39, 0.0 }
 0x1c6   :  { %v381_v49 = vpop.f32.mrf.mxu3 }
 0x1c7   :  { %410 = vst [vmem:[#allocation10 + $0x8] sm:$0xff] %v394_v40  ;;  %v382_v51 = vadd.f32 %v730_v34, %v381_v49 }
 0x1c9   :  { %v405_v53 = vmax.f32 %v382_v51, 0.0 }
 0x1ca   :  { %v351_v41 = vpop.f32.mrf.mxu2 }
 0x1cb   :  { %v352_v42 = vadd.f32 %v730_v34, %v351_v41  ;;  %421 = vst [vmem:[#allocation10 + $0x60] sm:$0xff] %v405_v53 }
 0x1cd   :  { %v395_v43 = vmax.f32 %v352_v42, 0.0 }
 0x1ce   :  { %v384_v54 = vpop.f32.mrf.mxu3 }
 0x1cf   :  { %411 = vst [vmem:[#allocation10 + $0x10] sm:$0xff] %v395_v43  ;;  %v385_v56 = vadd.f32 %v730_v34, %v384_v54 }
 0x1d1   :  { %v406_v58 = vmax.f32 %v385_v56, 0.0 }
 0x1d2   :  { %v354_v44 = vpop.f32.mrf.mxu2 }
 0x1d3   :  { %v355_v45 = vadd.f32 %v730_v34, %v354_v44  ;;  %422 = vst [vmem:[#allocation10 + $0x68] sm:$0xff] %v406_v58 }
 0x1d5   :  { %v396_v46 = vmax.f32 %v355_v45, 0.0 }
 0x1d6   :  { %v387_v60 = vpop.f32.mrf.mxu3 }
 0x1d7   :  { %412 = vst [vmem:[#allocation10 + $0x18] sm:$0xff] %v396_v46  ;;  %v388_v62 = vadd.f32 %v730_v34, %v387_v60 }
 0x1d9   :  { %v407_v0 = vmax.f32 %v388_v62, 0.0 }
 0x1da   :  { %v357_v47 = vpop.f32.mrf.mxu2 }
 0x1db   :  { %v358_v50 = vadd.f32 %v730_v34, %v357_v47  ;;  %423 = vst [vmem:[#allocation10 + $0x70] sm:$0xff] %v407_v0 }
 0x1dd   :  { %v397_v52 = vmax.f32 %v358_v50, 0.0 }
 0x1de   :  { %v390_v2 = vpop.f32.mrf.mxu3 }
 0x1df   :  { %413 = vst [vmem:[#allocation10 + $0x20] sm:$0xff] %v397_v52  ;;  %v391_v4 = vadd.f32 %v730_v34, %v390_v2 }
 0x1e1   :  { %v408_v6 = vmax.f32 %v391_v4, 0.0 }
 0x1e2   :  { %v360_v48 = vpop.f32.mrf.mxu2 }
 0x1e3   :  { %v361_v55 = vadd.f32 %v730_v34, %v360_v48  ;;  %424 = vst [vmem:[#allocation10 + $0x78] sm:$0xff] %v408_v6 }
 0x1e5   :  { %v398_v57 = vmax.f32 %v361_v55, 0.0 }
 0x1e7   :  { %414 = vst [vmem:[#allocation10 + $0x28] sm:$0xff] %v398_v57 }
 0x1ea   :  { %v363_v59 = vpop.f32.mrf.mxu2 }
 0x1eb   :  { %v364_v61 = vadd.f32 %v730_v34, %v363_v59 }
 0x1ed   :  { %v399_v63 = vmax.f32 %v364_v61, 0.0 }
 0x1ef   :  { %415 = vst [vmem:[#allocation10 + $0x30] sm:$0xff] %v399_v63 }
 0x1f2   :  { %v366_v1 = vpop.f32.mrf.mxu2 }
 0x1f3   :  { %v367_v3 = vadd.f32 %v730_v34, %v366_v1 }
 0x1f5   :  { %v400_v5 = vmax.f32 %v367_v3, 0.0 }
 0x1f7   :  { %416 = vst [vmem:[#allocation10 + $0x38] sm:$0xff] %v400_v5 }
 0x1fa   :  { %v369_v7 = vpop.f32.mrf.mxu2 }
 0x1fb   :  { %v370_v8 = vadd.f32 %v730_v34, %v369_v7 }
 0x1fd   :  { %v401_v9 = vmax.f32 %v370_v8, 0.0 }
 0x1ff   :  { %417 = vst [vmem:[#allocation10 + $0x40] sm:$0xff] %v401_v9 }
 0x202   :  { %v372_v10 = vpop.f32.mrf.mxu2 }
 0x203   :  { %v373_v11 = vadd.f32 %v730_v34, %v372_v10 }
 0x205   :  { %v402_v12 = vmax.f32 %v373_v11, 0.0 }
 0x207   :  { %418 = vst [vmem:[#allocation10 + $0x48] sm:$0xff] %v402_v12 }
 0x20a   :  { %v375_v13 = vpop.f32.mrf.mxu2 }
 0x20b   :  { %v376_v14 = vadd.f32 %v730_v34, %v375_v13 }
 0x20d   :  { %v403_v15 = vmax.f32 %v376_v14, 0.0 }
 0x20f   :  { %419 = vst [vmem:[#allocation10 + $0x50] sm:$0xff] %v403_v15 }
 0x212   :  { %v378_v16 = vpop.f32.mrf.mxu2 }
 0x213   :  { %v379_v17 = vadd.f32 %v730_v34, %v378_v16 }
 0x215   :  { %v404_v18 = vmax.f32 %v379_v17, 0.0 }
 0x217   :  { %420 = vst [vmem:[#allocation10 + $0x58] sm:$0xff] %v404_v18 }
 0x218   :  { %437 = dma.vmem_to_hbm [thread:$0]  %s430_s23, 2048, %s432_s26, [#allocation4], %s633_s9, %s633_s9, %s634_s10  }
 0x219   :  { %630 = dma.done.wait [#allocation4], 2048  }
 0x21a   :  { %631 = vsyncadd [#allocation4], 4294965248 }
 0x21b   :  { %442 = vsyncpa [#allocation3], 1 }
 0x21c   :  { %443 = vsyncpa [#allocation6], 1 }
 0x21d   :  { %444 = vsyncpa [#allocation9], 1 }
 0x21e   :  { %445 = vsyncpa [#allocation4], 1 }

// kernel: tpu_custom_call.1
= control target key start
LH: loop header
LB: loop body
LE: loop exit
PB: predicated region body
PF: predicated region fallthrough
CT: control target
= control target key end

     0   :  { %12 = vsyncpa [#allocation3], 0  ;;  %s754_s0 = inlined_call_operand.hbm [shape: f32[128,128], index: 0, kind: input, shape index: {}]   ;;  %s755_s1 = inlined_call_operand.hbm [shape: f32[128,128], index: 1, kind: input, shape index: {}]   ;;  %s756_s2 = inlined_call_operand.vmem [shape: f32[1,128], index: 2, kind: input, shape index: {}]   ;;  %s757_s3 = inlined_call_operand.hbm [shape: f32[128,128], index: 3, kind: input, shape index: {}]   ;;  %s758_s4 = inlined_call_operand.vmem [shape: f32[1,128], index: 4, kind: input, shape index: {}]   ;;  %s759_s5 = inlined_call_operand.hbm [shape: f32[128,128], index: 5, kind: input, shape index: {}]   ;;  %s760_s6 = inlined_call_operand.vmem [shape: f32[1,128], index: 6, kind: input, shape index: {}]   ;;  %s761_s7 = inlined_call_operand.hbm [shape: f32[128,128], index: 7, kind: output, shape index: {}]  }
   0x1   :  { %13 = vsyncpa [#allocation6], 0 }
   0x2   :  { %14 = vsyncpa [#allocation9], 0 }
   0x3   :  { %15 = vsyncpa [#allocation4], 0  ;;  %s33_s26 = sshll.u32 %s755_s1, 4  ;;  %s632_s27 = smov [#allocation5]   ;;  %s34_s26 = int_to_ptr.hbm [resolvable:$true] %s33_s26 }
   0x4   :  { %s35_s28 = sshll.u32 %s632_s27, 4  ;;  %s20_s8 = sshll.u32 %s754_s0, 4  ;;  %s36_s28 = int_to_ptr.vmem [resolvable:$true] %s35_s28  ;;  %s21_s8 = int_to_ptr.hbm [resolvable:$true] %s20_s8 }
   0x5   :  { %s633_s9 = smov 128   ;;  %s634_s10 = smov 8  }
   0x6   :  { %41 = dma.hbm_to_vmem [thread:$0]  %s34_s26, 2048, %s36_s28, [#allocation6], %s633_s9, %s633_s9, %s634_s10  }
   0x7   :  { %s635_s11 = smov [#allocation2]   ;;  %s48_s1 = sshll.u32 %s757_s3, 4  ;;  %s49_s1 = int_to_ptr.hbm [resolvable:$true] %s48_s1 }
   0x8   :  { %s22_s12 = sshll.u32 %s635_s11, 4  ;;  %s63_s16 = sshll.u32 %s759_s5, 4  ;;  %s23_s12 = int_to_ptr.vmem [resolvable:$true] %s22_s12  ;;  %s64_s16 = int_to_ptr.hbm [resolvable:$true] %s63_s16 }
   0x9   :  { %28 = dma.hbm_to_vmem [thread:$0]  %s21_s8, 2048, %s23_s12, [#allocation3], %s633_s9, %s633_s9, %s634_s10  }
   0xa   :  { %s636_s17 = smov [#allocation7]   ;;  %s637_s19 = smov [#allocation8]  }
   0xb   :  { %s50_s18 = sshll.u32 %s636_s17, 4  ;;  %s65_s3 = sshll.u32 %s637_s19, 4  ;;  %s51_s18 = int_to_ptr.vmem [resolvable:$true] %s50_s18  ;;  %s66_s3 = int_to_ptr.vmem [resolvable:$true] %s65_s3 }
   0xc   :  { %56 = dma.hbm_to_vmem [thread:$0]  %s49_s1, 2048, %s51_s18, [#allocation6], %s633_s9, %s633_s9, %s634_s10  }
   0xd   :  { %71 = dma.hbm_to_vmem [thread:$0]  %s64_s16, 2048, %s66_s3, [#allocation9], %s633_s9, %s633_s9, %s634_s10  }
   0xe   :  { %624 = dma.done.wait [#allocation3], 2048  }
   0xf   :  { %625 = vsyncadd [#allocation3], 4294965248 }
  0x10   :  { %626 = dma.done.wait [#allocation6], 4096  }
  0x11   :  { %627 = vsyncadd [#allocation6], 4294963200 }
  0x12   :  { %628 = dma.done.wait [#allocation9], 2048  }
  0x13   :  { %629 = vsyncadd [#allocation9], 4294965248  ;;  %v121_v0 = vld [vmem:[#allocation5 + $0x78] sm:$0xff]  ;;  %v120_v1 = vld [vmem:[#allocation5 + $0x70] sm:$0xff]  ;;  %s431_s26 = sshll.u32 %s761_s7, 4  ;;  %s432_s26 = int_to_ptr.hbm [resolvable:$true] %s431_s26 }
  0x14   :  { %126 = vmatpush.msra.mxu0 %v121_v0  ;;  %446 = vmatpush.msra.mxu3 %v121_v0  ;;  %v119_v2 = vld [vmem:[#allocation5 + $0x68] sm:$0xff]  ;;  %v118_v3 = vld [vmem:[#allocation5 + $0x60] sm:$0xff]  ;;  %v117_v4 = vld [vmem:[#allocation5 + $0x58] sm:$0xff] }
  0x15   :  { %v116_v5 = vld [vmem:[#allocation5 + $0x50] sm:$0xff]  ;;  %v115_v6 = vld [vmem:[#allocation5 + $0x48] sm:$0xff]  ;;  %v114_v7 = vld [vmem:[#allocation5 + $0x40] sm:$0xff] }
  0x16   :  { %127 = vmatpush.msra.mxu0 %v120_v1  ;;  %447 = vmatpush.msra.mxu3 %v120_v1  ;;  %v113_v8 = vld [vmem:[#allocation5 + $0x38] sm:$0xff]  ;;  %v112_v9 = vld [vmem:[#allocation5 + $0x30] sm:$0xff]  ;;  %v111_v10 = vld [vmem:[#allocation5 + $0x28] sm:$0xff] }
  0x17   :  { %v110_v11 = vld [vmem:[#allocation5 + $0x20] sm:$0xff]  ;;  %v109_v12 = vld [vmem:[#allocation5 + $0x18] sm:$0xff]  ;;  %v108_v13 = vld [vmem:[#allocation5 + $0x10] sm:$0xff] }
  0x18   :  { %128 = vmatpush.msra.mxu0 %v119_v2  ;;  %448 = vmatpush.msra.mxu3 %v119_v2  ;;  %v107_v14 = vld [vmem:[#allocation5 + $0x8] sm:$0xff]  ;;  %v106_v15 = vld [vmem:[#allocation5] sm:$0xff]  ;;  %v92_v18 = vld [vmem:[#allocation2 + $0x10] sm:$0xff] }
  0x19   :  { %v90_v16 = vld [vmem:[#allocation2] sm:$0xff]  ;;  %v91_v17 = vld [vmem:[#allocation2 + $0x8] sm:$0xff]  ;;  %v93_v20 = vld [vmem:[#allocation2 + $0x18] sm:$0xff] }
  0x1a   :  { %129 = vmatpush.msra.mxu0 %v118_v3  ;;  %449 = vmatpush.msra.mxu3 %v118_v3  ;;  %v102_v19 = vld [vmem:[#allocation2 + $0x60] sm:$0xff]  ;;  %v103_v21 = vld [vmem:[#allocation2 + $0x68] sm:$0xff]  ;;  %v104_v23 = vld [vmem:[#allocation2 + $0x70] sm:$0xff] }
  0x1b   :  { %v94_v22 = vld [vmem:[#allocation2 + $0x20] sm:$0xff]  ;;  %v95_v24 = vld [vmem:[#allocation2 + $0x28] sm:$0xff]  ;;  %v105_v25 = vld [vmem:[#allocation2 + $0x78] sm:$0xff] }
  0x1c   :  { %130 = vmatpush.msra.mxu0 %v117_v4  ;;  %450 = vmatpush.msra.mxu3 %v117_v4  ;;  %v96_v26 = vld [vmem:[#allocation2 + $0x30] sm:$0xff]  ;;  %v97_v27 = vld [vmem:[#allocation2 + $0x38] sm:$0xff]  ;;  %v220_v30 = vld [vmem:[#allocation7 + $0x68] sm:$0xff] }
  0x1d   :  { %v222_v28 = vld [vmem:[#allocation7 + $0x78] sm:$0xff]  ;;  %v221_v29 = vld [vmem:[#allocation7 + $0x70] sm:$0xff]  ;;  %v219_v31 = vld [vmem:[#allocation7 + $0x60] sm:$0xff] }
  0x1e   :  { %131 = vmatpush.msra.mxu0 %v116_v5  ;;  %451 = vmatpush.msra.mxu3 %v116_v5  ;;  %v98_v32 = vld [vmem:[#allocation2 + $0x40] sm:$0xff]  ;;  %v218_v33 = vld [vmem:[#allocation7 + $0x58] sm:$0xff]  ;;  %v217_v34 = vld [vmem:[#allocation7 + $0x50] sm:$0xff] }
  0x1f   :  { %227 = vmatpush.msra.mxu1 %v222_v28  ;;  %v216_v35 = vld [vmem:[#allocation7 + $0x48] sm:$0xff]  ;;  %v215_v36 = vld [vmem:[#allocation7 + $0x40] sm:$0xff]  ;;  %v214_v38 = vld [vmem:[#allocation7 + $0x38] sm:$0xff] }
  0x20   :  { %132 = vmatpush.msra.mxu0 %v115_v6  ;;  %452 = vmatpush.msra.mxu3 %v115_v6  ;;  %v99_v37 = vld [vmem:[#allocation2 + $0x48] sm:$0xff]  ;;  %v213_v39 = vld [vmem:[#allocation7 + $0x30] sm:$0xff]  ;;  %v211_v41 = vld [vmem:[#allocation7 + $0x20] sm:$0xff] }
  0x21   :  { %228 = vmatpush.msra.mxu1 %v221_v29  ;;  %v212_v40 = vld [vmem:[#allocation7 + $0x28] sm:$0xff]  ;;  %v100_v42 = vld [vmem:[#allocation2 + $0x50] sm:$0xff]  ;;  %v210_v43 = vld [vmem:[#allocation7 + $0x18] sm:$0xff] }
  0x22   :  { %133 = vmatpush.msra.mxu0 %v114_v7  ;;  %453 = vmatpush.msra.mxu3 %v114_v7  ;;  %v101_v44 = vld [vmem:[#allocation2 + $0x58] sm:$0xff]  ;;  %v209_v45 = vld [vmem:[#allocation7 + $0x10] sm:$0xff]  ;;  %v208_v46 = vld [vmem:[#allocation7 + $0x8] sm:$0xff] }
  0x23   :  { %229 = vmatpush.msra.mxu1 %v220_v30  ;;  %v207_v47 = vld [vmem:[#allocation7] sm:$0xff] }
  0x24   :  { %134 = vmatpush.msra.mxu0 %v113_v8  ;;  %454 = vmatpush.msra.mxu3 %v113_v8  ;;  %v706_v48 = vld [vmem:[%s756_s2] ss:$0 sm:$0xff] }
  0x25   :  { %230 = vmatpush.msra.mxu1 %v219_v31 }
  0x26   :  { %135 = vmatpush.msra.mxu0 %v112_v9  ;;  %455 = vmatpush.msra.mxu3 %v112_v9 }
  0x27   :  { %231 = vmatpush.msra.mxu1 %v218_v33 }
  0x28   :  { %136 = vmatpush.msra.mxu0 %v111_v10  ;;  %456 = vmatpush.msra.mxu3 %v111_v10 }
  0x29   :  { %232 = vmatpush.msra.mxu1 %v217_v34 }
  0x2a   :  { %137 = vmatpush.msra.mxu0 %v110_v11  ;;  %457 = vmatpush.msra.mxu3 %v110_v11 }
  0x2b   :  { %233 = vmatpush.msra.mxu1 %v216_v35 }
  0x2c   :  { %138 = vmatpush.msra.mxu0 %v109_v12  ;;  %458 = vmatpush.msra.mxu3 %v109_v12 }
  0x2d   :  { %234 = vmatpush.msra.mxu1 %v215_v36 }
  0x2e   :  { %139 = vmatpush.msra.mxu0 %v108_v13  ;;  %459 = vmatpush.msra.mxu3 %v108_v13 }
  0x2f   :  { %235 = vmatpush.msra.mxu1 %v214_v38 }
  0x30   :  { %140 = vmatpush.msra.mxu0 %v107_v14  ;;  %460 = vmatpush.msra.mxu3 %v107_v14 }
  0x31   :  { %236 = vmatpush.msra.mxu1 %v213_v39 }
  0x32   :  { %141 = vmatpush.msra.mxu0 %v106_v15  ;;  %461 = vmatpush.msra.mxu3 %v106_v15 }
  0x33   :  { %142 = vmatmul.f32.vlgmr.msra.gmra.mxu0 %v90_v16  ;;  %178 = vmatmul.f32.vlgmr.msra.gmra.mxu3 %v102_v19 }
  0x34   :  { %462 = vmatpush.msrb.mxu3 %v222_v28  ;;  %237 = vmatpush.msra.mxu1 %v212_v40  ;;  %v319_v28 = vld [vmem:[#allocation8 + $0x58] sm:$0xff] }
  0x36   :  { %463 = vmatpush.msrb.mxu3 %v221_v29  ;;  %238 = vmatpush.msra.mxu1 %v211_v41  ;;  %v318_v29 = vld [vmem:[#allocation8 + $0x50] sm:$0xff] }
  0x38   :  { %464 = vmatpush.msrb.mxu3 %v220_v30  ;;  %239 = vmatpush.msra.mxu1 %v210_v43  ;;  %v317_v30 = vld [vmem:[#allocation8 + $0x48] sm:$0xff] }
  0x3a   :  { %465 = vmatpush.msrb.mxu3 %v219_v31  ;;  %240 = vmatpush.msra.mxu1 %v209_v45 }
  0x3b   :  { %145 = vmatmul.f32.gmra.mxu0 %v91_v17  ;;  %181 = vmatmul.f32.gmra.mxu3 %v103_v21  ;;  %v323_v21 = vld [vmem:[#allocation8 + $0x78] sm:$0xff] }
  0x3c   :  { %466 = vmatpush.msrb.mxu3 %v218_v33  ;;  %241 = vmatpush.msra.mxu1 %v208_v46  ;;  %v316_v33 = vld [vmem:[#allocation8 + $0x40] sm:$0xff] }
  0x3d   :  { %328 = vmatpush.msra.mxu2 %v323_v21 }
  0x3e   :  { %467 = vmatpush.msrb.mxu3 %v217_v34  ;;  %242 = vmatpush.msra.mxu1 %v207_v47 }
  0x40   :  { %468 = vmatpush.msrb.mxu3 %v216_v35  ;;  %v315_v35 = vld [vmem:[#allocation8 + $0x38] sm:$0xff] }
  0x42   :  { %469 = vmatpush.msrb.mxu3 %v215_v36  ;;  %v314_v36 = vld [vmem:[#allocation8 + $0x30] sm:$0xff] }
  0x43   :  { %148 = vmatmul.f32.gmra.mxu0 %v92_v18  ;;  %184 = vmatmul.f32.gmra.mxu3 %v104_v23  ;;  %v321_v23 = vld [vmem:[#allocation8 + $0x68] sm:$0xff] }
  0x44   :  { %470 = vmatpush.msrb.mxu3 %v214_v38 }
  0x46   :  { %471 = vmatpush.msrb.mxu3 %v213_v39 }
  0x48   :  { %472 = vmatpush.msrb.mxu3 %v212_v40  ;;  %v312_v40 = vld [vmem:[#allocation8 + $0x20] sm:$0xff] }
  0x4a   :  { %473 = vmatpush.msrb.mxu3 %v211_v41 }
  0x4b   :  { %151 = vmatmul.f32.gmra.mxu0 %v93_v20  ;;  %187 = vmatmul.f32.gmra.mxu3 %v105_v25 }
  0x4c   :  { %474 = vmatpush.msrb.mxu3 %v210_v43 }
  0x4e   :  { %475 = vmatpush.msrb.mxu3 %v209_v45 }
  0x50   :  { %476 = vmatpush.msrb.mxu3 %v208_v46  ;;  %v310_v46 = vld [vmem:[#allocation8 + $0x10] sm:$0xff] }
  0x52   :  { %477 = vmatpush.msrb.mxu3 %v207_v47  ;;  %v309_v47 = vld [vmem:[#allocation8 + $0x8] sm:$0xff] }
  0x53   :  { %154 = vmatmul.f32.gmra.mxu0 %v94_v22  ;;  %v322_v22 = vld [vmem:[#allocation8 + $0x70] sm:$0xff] }
  0x54   :  { %478 = vmatpush.msra.mxu3 %v323_v21  ;;  %329 = vmatpush.msra.mxu2 %v322_v22 }
  0x56   :  { %479 = vmatpush.msra.mxu3 %v322_v22  ;;  %330 = vmatpush.msra.mxu2 %v321_v23 }
  0x58   :  { %480 = vmatpush.msra.mxu3 %v321_v23 }
  0x5b   :  { %157 = vmatmul.f32.gmra.mxu0 %v95_v24 }
  0x63   :  { %160 = vmatmul.f32.gmra.mxu0 %v96_v26  ;;  %v320_v26 = vld [vmem:[#allocation8 + $0x60] sm:$0xff] }
  0x64   :  { %331 = vmatpush.msra.mxu2 %v320_v26  ;;  %481 = vmatpush.msra.mxu3 %v320_v26 }
  0x66   :  { %332 = vmatpush.msra.mxu2 %v319_v28  ;;  %482 = vmatpush.msra.mxu3 %v319_v28 }
  0x68   :  { %333 = vmatpush.msra.mxu2 %v318_v29  ;;  %483 = vmatpush.msra.mxu3 %v318_v29 }
  0x6a   :  { %334 = vmatpush.msra.mxu2 %v317_v30  ;;  %484 = vmatpush.msra.mxu3 %v317_v30 }
  0x6b   :  { %163 = vmatmul.f32.gmra.mxu0 %v97_v27 }
  0x6c   :  { %335 = vmatpush.msra.mxu2 %v316_v33  ;;  %485 = vmatpush.msra.mxu3 %v316_v33 }
  0x6e   :  { %336 = vmatpush.msra.mxu2 %v315_v35  ;;  %486 = vmatpush.msra.mxu3 %v315_v35 }
  0x70   :  { %337 = vmatpush.msra.mxu2 %v314_v36  ;;  %487 = vmatpush.msra.mxu3 %v314_v36 }
  0x73   :  { %166 = vmatmul.f32.gmra.mxu0 %v98_v32 }
  0x7b   :  { %169 = vmatmul.f32.gmra.mxu0 %v99_v37  ;;  %v313_v37 = vld [vmem:[#allocation8 + $0x28] sm:$0xff] }
  0x7c   :  { %338 = vmatpush.msra.mxu2 %v313_v37  ;;  %488 = vmatpush.msra.mxu3 %v313_v37 }
  0x7e   :  { %339 = vmatpush.msra.mxu2 %v312_v40  ;;  %489 = vmatpush.msra.mxu3 %v312_v40 }
  0x83   :  { %172 = vmatmul.f32.gmra.mxu0 %v100_v42  ;;  %v311_v42 = vld [vmem:[#allocation8 + $0x18] sm:$0xff] }
  0x84   :  { %340 = vmatpush.msra.mxu2 %v311_v42  ;;  %490 = vmatpush.msra.mxu3 %v311_v42 }
  0x86   :  { %341 = vmatpush.msra.mxu2 %v310_v46  ;;  %491 = vmatpush.msra.mxu3 %v310_v46 }
  0x88   :  { %342 = vmatpush.msra.mxu2 %v309_v47  ;;  %492 = vmatpush.msra.mxu3 %v309_v47 }
  0x8b   :  { %175 = vmatmul.f32.gmra.mxu0 %v101_v44 }
  0xb0   :  { %v143_v49 = vpop.f32.mrf.mxu0 }
  0xb1   :  { %v144_v50 = vadd.f32 %v706_v48, %v143_v49  ;;  %v308_v49 = vld [vmem:[#allocation8] sm:$0xff] }
  0xb2   :  { %343 = vmatpush.msra.mxu2 %v308_v49  ;;  %493 = vmatpush.msra.mxu3 %v308_v49 }
  0xb3   :  { %v191_v51 = vmax.f32 %v144_v50, 0.0  ;;  %v502_v50 = vld [vmem:[%s758_s4] ss:$0 sm:$0xff] }
  0xb5   :  { %243 = vmatmul.f32.vlgmr.msra.gmra.mxu1 %v191_v51 }
  0xb6   :  { %v179_v60 = vpop.f32.mrf.mxu3 }
  0xb7   :  { %v180_v62 = vadd.f32 %v706_v48, %v179_v60 }
  0xb8   :  { %v146_v52 = vpop.f32.mrf.mxu0 }
  0xb9   :  { %v147_v53 = vadd.f32 %v706_v48, %v146_v52  ;;  %v203_v63 = vmax.f32 %v180_v62, 0.0 }
  0xbb   :  { %v192_v54 = vmax.f32 %v147_v53, 0.0  ;;  %279 = vmatmul.f32.vlgmr.msrb.gmra.mxu3 %v203_v63 }
  0xbd   :  { %246 = vmatmul.f32.gmra.mxu1 %v192_v54 }
  0xbe   :  { %v182_v2 = vpop.f32.mrf.mxu3 }
  0xbf   :  { %v183_v4 = vadd.f32 %v706_v48, %v182_v2 }
  0xc0   :  { %v149_v55 = vpop.f32.mrf.mxu0 }
  0xc1   :  { %v150_v56 = vadd.f32 %v706_v48, %v149_v55  ;;  %v204_v5 = vmax.f32 %v183_v4, 0.0 }
  0xc3   :  { %v193_v57 = vmax.f32 %v150_v56, 0.0  ;;  %282 = vmatmul.f32.gmra.mxu3 %v204_v5 }
  0xc5   :  { %249 = vmatmul.f32.gmra.mxu1 %v193_v57 }
  0xc6   :  { %v185_v8 = vpop.f32.mrf.mxu3 }
  0xc7   :  { %v186_v10 = vadd.f32 %v706_v48, %v185_v8 }
  0xc8   :  { %v152_v58 = vpop.f32.mrf.mxu0 }
  0xc9   :  { %v153_v59 = vadd.f32 %v706_v48, %v152_v58  ;;  %v205_v11 = vmax.f32 %v186_v10, 0.0 }
  0xcb   :  { %v194_v61 = vmax.f32 %v153_v59, 0.0  ;;  %285 = vmatmul.f32.gmra.mxu3 %v205_v11 }
  0xcd   :  { %252 = vmatmul.f32.gmra.mxu1 %v194_v61 }
  0xce   :  { %v188_v14 = vpop.f32.mrf.mxu3 }
  0xcf   :  { %v189_v16 = vadd.f32 %v706_v48, %v188_v14 }
  0xd0   :  { %v155_v0 = vpop.f32.mrf.mxu0 }
  0xd1   :  { %v156_v1 = vadd.f32 %v706_v48, %v155_v0  ;;  %v206_v17 = vmax.f32 %v189_v16, 0.0 }
  0xd3   :  { %v195_v3 = vmax.f32 %v156_v1, 0.0  ;;  %288 = vmatmul.f32.gmra.mxu3 %v206_v17 }
  0xd5   :  { %255 = vmatmul.f32.gmra.mxu1 %v195_v3 }
  0xd8   :  { %v158_v6 = vpop.f32.mrf.mxu0 }
  0xd9   :  { %v159_v7 = vadd.f32 %v706_v48, %v158_v6 }
  0xdb   :  { %v196_v9 = vmax.f32 %v159_v7, 0.0 }
  0xdd   :  { %258 = vmatmul.f32.gmra.mxu1 %v196_v9 }
  0xe0   :  { %v161_v12 = vpop.f32.mrf.mxu0 }
  0xe1   :  { %v162_v13 = vadd.f32 %v706_v48, %v161_v12 }
  0xe3   :  { %v197_v15 = vmax.f32 %v162_v13, 0.0 }
  0xe5   :  { %261 = vmatmul.f32.gmra.mxu1 %v197_v15 }
  0xe8   :  { %v164_v18 = vpop.f32.mrf.mxu0 }
  0xe9   :  { %v165_v19 = vadd.f32 %v706_v48, %v164_v18 }
  0xeb   :  { %v198_v20 = vmax.f32 %v165_v19, 0.0 }
  0xed   :  { %264 = vmatmul.f32.gmra.mxu1 %v198_v20 }
  0xf0   :  { %v167_v24 = vpop.f32.mrf.mxu0 }
  0xf1   :  { %v168_v25 = vadd.f32 %v706_v48, %v167_v24 }
  0xf3   :  { %v199_v27 = vmax.f32 %v168_v25, 0.0 }
  0xf5   :  { %267 = vmatmul.f32.gmra.mxu1 %v199_v27 }
  0xf8   :  { %v170_v31 = vpop.f32.mrf.mxu0 }
  0xf9   :  { %v171_v32 = vadd.f32 %v706_v48, %v170_v31 }
  0xfb   :  { %v200_v34 = vmax.f32 %v171_v32, 0.0 }
  0xfd   :  { %270 = vmatmul.f32.gmra.mxu1 %v200_v34  ;;  %v730_v34 = vld [vmem:[%s760_s6] ss:$0 sm:$0xff]  ;;  %s638_s6 = smov [#allocation10]  }
  0xfe   :  { %s429_s23 = sshll.u32 %s638_s6, 4  ;;  %s430_s23 = int_to_ptr.vmem [resolvable:$true] %s429_s23 }
 0x100   :  { %v173_v38 = vpop.f32.mrf.mxu0 }
 0x101   :  { %v174_v39 = vadd.f32 %v706_v48, %v173_v38 }
 0x103   :  { %v201_v41 = vmax.f32 %v174_v39, 0.0 }
 0x105   :  { %273 = vmatmul.f32.gmra.mxu1 %v201_v41 }
 0x108   :  { %v176_v43 = vpop.f32.mrf.mxu0 }
 0x109   :  { %v177_v44 = vadd.f32 %v706_v48, %v176_v43 }
 0x10b   :  { %v202_v45 = vmax.f32 %v177_v44, 0.0 }
 0x10d   :  { %276 = vmatmul.f32.gmra.mxu1 %v202_v45 }
 0x132   :  { %v244_v51 = vpop.f32.mrf.mxu1 }
 0x133   :  { %v245_v52 = vadd.f32 %v502_v50, %v244_v51 }
 0x135   :  { %v292_v53 = vmax.f32 %v245_v52, 0.0 }
 0x137   :  { %344 = vmatmul.f32.vlgmr.msra.gmra.mxu2 %v292_v53 }
 0x13a   :  { %v247_v48 = vpop.f32.mrf.mxu1 }
 0x13b   :  { %v248_v54 = vadd.f32 %v502_v50, %v247_v48 }
 0x13d   :  { %v293_v55 = vmax.f32 %v248_v54, 0.0 }
 0x13e   :  { %v280_v63 = vpop.f32.mrf.mxu3 }
 0x13f   :  { %347 = vmatmul.f32.gmra.mxu2 %v293_v55  ;;  %v281_v1 = vadd.f32 %v502_v50, %v280_v63 }
 0x141   :  { %v304_v3 = vmax.f32 %v281_v1, 0.0 }
 0x142   :  { %v250_v56 = vpop.f32.mrf.mxu1 }
 0x143   :  { %v251_v57 = vadd.f32 %v502_v50, %v250_v56  ;;  %380 = vmatmul.f32.vlgmr.msra.gmra.mxu3 %v304_v3 }
 0x145   :  { %v294_v58 = vmax.f32 %v251_v57, 0.0 }
 0x146   :  { %v283_v5 = vpop.f32.mrf.mxu3 }
 0x147   :  { %350 = vmatmul.f32.gmra.mxu2 %v294_v58  ;;  %v284_v7 = vadd.f32 %v502_v50, %v283_v5 }
 0x149   :  { %v305_v9 = vmax.f32 %v284_v7, 0.0 }
 0x14a   :  { %v253_v59 = vpop.f32.mrf.mxu1 }
 0x14b   :  { %v254_v60 = vadd.f32 %v502_v50, %v253_v59  ;;  %383 = vmatmul.f32.gmra.mxu3 %v305_v9 }
 0x14d   :  { %v295_v61 = vmax.f32 %v254_v60, 0.0 }
 0x14e   :  { %v286_v11 = vpop.f32.mrf.mxu3 }
 0x14f   :  { %353 = vmatmul.f32.gmra.mxu2 %v295_v61  ;;  %v287_v13 = vadd.f32 %v502_v50, %v286_v11 }
 0x151   :  { %v306_v15 = vmax.f32 %v287_v13, 0.0 }
 0x152   :  { %v256_v62 = vpop.f32.mrf.mxu1 }
 0x153   :  { %v257_v0 = vadd.f32 %v502_v50, %v256_v62  ;;  %386 = vmatmul.f32.gmra.mxu3 %v306_v15 }
 0x155   :  { %v296_v2 = vmax.f32 %v257_v0, 0.0 }
 0x156   :  { %v289_v17 = vpop.f32.mrf.mxu3 }
 0x157   :  { %356 = vmatmul.f32.gmra.mxu2 %v296_v2  ;;  %v290_v19 = vadd.f32 %v502_v50, %v289_v17 }
 0x159   :  { %v307_v21 = vmax.f32 %v290_v19, 0.0 }
 0x15a   :  { %v259_v4 = vpop.f32.mrf.mxu1 }
 0x15b   :  { %v260_v6 = vadd.f32 %v502_v50, %v259_v4  ;;  %389 = vmatmul.f32.gmra.mxu3 %v307_v21 }
 0x15d   :  { %v297_v8 = vmax.f32 %v260_v6, 0.0 }
 0x15f   :  { %359 = vmatmul.f32.gmra.mxu2 %v297_v8 }
 0x162   :  { %v262_v10 = vpop.f32.mrf.mxu1 }
 0x163   :  { %v263_v12 = vadd.f32 %v502_v50, %v262_v10 }
 0x165   :  { %v298_v14 = vmax.f32 %v263_v12, 0.0 }
 0x167   :  { %362 = vmatmul.f32.gmra.mxu2 %v298_v14 }
 0x16a   :  { %v265_v16 = vpop.f32.mrf.mxu1 }
 0x16b   :  { %v266_v18 = vadd.f32 %v502_v50, %v265_v16 }
 0x16d   :  { %v299_v20 = vmax.f32 %v266_v18, 0.0 }
 0x16f   :  { %365 = vmatmul.f32.gmra.mxu2 %v299_v20 }
 0x172   :  { %v268_v22 = vpop.f32.mrf.mxu1 }
 0x173   :  { %v269_v23 = vadd.f32 %v502_v50, %v268_v22 }
 0x175   :  { %v300_v24 = vmax.f32 %v269_v23, 0.0 }
 0x177   :  { %368 = vmatmul.f32.gmra.mxu2 %v300_v24 }
 0x17a   :  { %v271_v25 = vpop.f32.mrf.mxu1 }
 0x17b   :  { %v272_v26 = vadd.f32 %v502_v50, %v271_v25 }
 0x17d   :  { %v301_v27 = vmax.f32 %v272_v26, 0.0 }
 0x17f   :  { %371 = vmatmul.f32.gmra.mxu2 %v301_v27 }
 0x182   :  { %v274_v28 = vpop.f32.mrf.mxu1 }
 0x183   :  { %v275_v29 = vadd.f32 %v502_v50, %v274_v28 }
 0x185   :  { %v302_v30 = vmax.f32 %v275_v29, 0.0 }
 0x187   :  { %374 = vmatmul.f32.gmra.mxu2 %v302_v30 }
 0x18a   :  { %v277_v31 = vpop.f32.mrf.mxu1 }
 0x18b   :  { %v278_v32 = vadd.f32 %v502_v50, %v277_v31 }
 0x18d   :  { %v303_v33 = vmax.f32 %v278_v32, 0.0 }
 0x18f   :  { %377 = vmatmul.f32.gmra.mxu2 %v303_v33 }
 0x1ba   :  { %v345_v35 = vpop.f32.mrf.mxu2 }
 0x1bb   :  { %v346_v36 = vadd.f32 %v730_v34, %v345_v35 }
 0x1bd   :  { %v393_v37 = vmax.f32 %v346_v36, 0.0 }
 0x1bf   :  { %409 = vst [vmem:[#allocation10] sm:$0xff] %v393_v37 }
 0x1c2   :  { %v348_v38 = vpop.f32.mrf.mxu2 }
 0x1c3   :  { %v349_v39 = vadd.f32 %v730_v34, %v348_v38 }
 0x1c5   :  { %v394_v40 = vmax.f32 %v349_v39, 0.0 }
 0x1c6   :  { %v381_v49 = vpop.f32.mrf.mxu3 }
 0x1c7   :  { %410 = vst [vmem:[#allocation10 + $0x8] sm:$0xff] %v394_v40  ;;  %v382_v51 = vadd.f32 %v730_v34, %v381_v49 }
 0x1c9   :  { %v405_v53 = vmax.f32 %v382_v51, 0.0 }
 0x1ca   :  { %v351_v41 = vpop.f32.mrf.mxu2 }
 0x1cb   :  { %v352_v42 = vadd.f32 %v730_v34, %v351_v41  ;;  %421 = vst [vmem:[#allocation10 + $0x60] sm:$0xff] %v405_v53 }
 0x1cd   :  { %v395_v43 = vmax.f32 %v352_v42, 0.0 }
 0x1ce   :  { %v384_v54 = vpop.f32.mrf.mxu3 }
 0x1cf   :  { %411 = vst [vmem:[#allocation10 + $0x10] sm:$0xff] %v395_v43  ;;  %v385_v56 = vadd.f32 %v730_v34, %v384_v54 }
 0x1d1   :  { %v406_v58 = vmax.f32 %v385_v56, 0.0 }
 0x1d2   :  { %v354_v44 = vpop.f32.mrf.mxu2 }
 0x1d3   :  { %v355_v45 = vadd.f32 %v730_v34, %v354_v44  ;;  %422 = vst [vmem:[#allocation10 + $0x68] sm:$0xff] %v406_v58 }
 0x1d5   :  { %v396_v46 = vmax.f32 %v355_v45, 0.0 }
 0x1d6   :  { %v387_v60 = vpop.f32.mrf.mxu3 }
 0x1d7   :  { %412 = vst [vmem:[#allocation10 + $0x18] sm:$0xff] %v396_v46  ;;  %v388_v62 = vadd.f32 %v730_v34, %v387_v60 }
 0x1d9   :  { %v407_v0 = vmax.f32 %v388_v62, 0.0 }
 0x1da   :  { %v357_v47 = vpop.f32.mrf.mxu2 }
 0x1db   :  { %v358_v50 = vadd.f32 %v730_v34, %v357_v47  ;;  %423 = vst [vmem:[#allocation10 + $0x70] sm:$0xff] %v407_v0 }
 0x1dd   :  { %v397_v52 = vmax.f32 %v358_v50, 0.0 }
 0x1de   :  { %v390_v2 = vpop.f32.mrf.mxu3 }
 0x1df   :  { %413 = vst [vmem:[#allocation10 + $0x20] sm:$0xff] %v397_v52  ;;  %v391_v4 = vadd.f32 %v730_v34, %v390_v2 }
 0x1e1   :  { %v408_v6 = vmax.f32 %v391_v4, 0.0 }
 0x1e2   :  { %v360_v48 = vpop.f32.mrf.mxu2 }
 0x1e3   :  { %v361_v55 = vadd.f32 %v730_v34, %v360_v48  ;;  %424 = vst [vmem:[#allocation10 + $0x78] sm:$0xff] %v408_v6 }
 0x1e5   :  { %v398_v57 = vmax.f32 %v361_v55, 0.0 }
 0x1e7   :  { %414 = vst [vmem:[#allocation10 + $0x28] sm:$0xff] %v398_v57 }
 0x1ea   :  { %v363_v59 = vpop.f32.mrf.mxu2 }
 0x1eb   :  { %v364_v61 = vadd.f32 %v730_v34, %v363_v59 }
 0x1ed   :  { %v399_v63 = vmax.f32 %v364_v61, 0.0 }
 0x1ef   :  { %415 = vst [vmem:[#allocation10 + $0x30] sm:$0xff] %v399_v63 }
 0x1f2   :  { %v366_v1 = vpop.f32.mrf.mxu2 }
 0x1f3   :  { %v367_v3 = vadd.f32 %v730_v34, %v366_v1 }
 0x1f5   :  { %v400_v5 = vmax.f32 %v367_v3, 0.0 }
 0x1f7   :  { %416 = vst [vmem:[#allocation10 + $0x38] sm:$0xff] %v400_v5 }
 0x1fa   :  { %v369_v7 = vpop.f32.mrf.mxu2 }
 0x1fb   :  { %v370_v8 = vadd.f32 %v730_v34, %v369_v7 }
 0x1fd   :  { %v401_v9 = vmax.f32 %v370_v8, 0.0 }
 0x1ff   :  { %417 = vst [vmem:[#allocation10 + $0x40] sm:$0xff] %v401_v9 }
 0x202   :  { %v372_v10 = vpop.f32.mrf.mxu2 }
 0x203   :  { %v373_v11 = vadd.f32 %v730_v34, %v372_v10 }
 0x205   :  { %v402_v12 = vmax.f32 %v373_v11, 0.0 }
 0x207   :  { %418 = vst [vmem:[#allocation10 + $0x48] sm:$0xff] %v402_v12 }
 0x20a   :  { %v375_v13 = vpop.f32.mrf.mxu2 }
 0x20b   :  { %v376_v14 = vadd.f32 %v730_v34, %v375_v13 }
 0x20d   :  { %v403_v15 = vmax.f32 %v376_v14, 0.0 }
 0x20f   :  { %419 = vst [vmem:[#allocation10 + $0x50] sm:$0xff] %v403_v15 }
 0x212   :  { %v378_v16 = vpop.f32.mrf.mxu2 }
 0x213   :  { %v379_v17 = vadd.f32 %v730_v34, %v378_v16 }
 0x215   :  { %v404_v18 = vmax.f32 %v379_v17, 0.0 }
 0x217   :  { %420 = vst [vmem:[#allocation10 + $0x58] sm:$0xff] %v404_v18 }
 0x218   :  { %437 = dma.vmem_to_hbm [thread:$0]  %s430_s23, 2048, %s432_s26, [#allocation4], %s633_s9, %s633_s9, %s634_s10  }
 0x219   :  { %630 = dma.done.wait [#allocation4], 2048  }
 0x21a   :  { %631 = vsyncadd [#allocation4], 4294965248 }
 0x21b   :  { %442 = vsyncpa [#allocation3], 1 }
 0x21c   :  { %443 = vsyncpa [#allocation6], 1 }
 0x21d   :  { %444 = vsyncpa [#allocation9], 1 }
 0x21e   :  { %445 = vsyncpa [#allocation4], 1 }

</bundles_post_ra>
